<compile_context>
chip_gen: v6e
topology: v6e:2x2x1
jax: 0.10.0
libtpu: 0.0.40
codegen_flags: <defaults>
</compile_context>

<pallas_src>
import functools
import math

import jax
import jax.numpy as jnp
from jax.experimental import pallas as pl
from jax.experimental.pallas import tpu as pltpu


# ---------------------------------------------------------------------------
# In-kernel helpers (f32 math)
# ---------------------------------------------------------------------------
def _layer_norm(x, gamma, beta, eps=1e-5):
    # nn.LayerNorm: biased variance over the last axis.
    mean = jnp.mean(x, axis=-1, keepdims=True)
    var = jnp.mean((x - mean) ** 2, axis=-1, keepdims=True)
    return (x - mean) * jax.lax.rsqrt(var + eps) * gamma + beta


def _gelu(x):
    # tanh-approximate GELU; tanh runs on the EUP (free co-issue slot).
    c = 0.7978845608028654  # sqrt(2/pi)
    return 0.5 * x * (1.0 + jnp.tanh(c * (x + 0.044715 * x * x * x)))


# ---------------------------------------------------------------------------
# Fused Encoder kernel: grid = (batch, depth)
# ---------------------------------------------------------------------------
def encoder_kernel(x_ref, ln1g_ref, ln1b_ref, wqkv_ref, bqkv_ref, wo_ref,
                   bo_ref, ln2g_ref, ln2b_ref, w1_ref, b1_ref, w2_ref, b2_ref,
                   out_ref, xres_ref, *, num_heads):
    d_idx = pl.program_id(1)
    _, S, E = x_ref.shape
    H = num_heads
    dh = E // H
    scale = 1.0 / math.sqrt(dh)

    # First layer for this batch element: load residual stream into VMEM.
    @pl.when(d_idx == 0)
    def _():
        xres_ref[...] = x_ref[0].astype(jnp.float32)

    x = xres_ref[...]                                   # (S, E) f32

    # ---- LayerNorm 1 + QKV projections (bf16 matmuls, f32 accumulate) ------
    h = _layer_norm(x, ln1g_ref[0], ln1b_ref[0])
    hb = h.astype(jnp.bfloat16)
    bqkv = bqkv_ref[0]                                  # (3, E) f32
    q = jnp.dot(hb, wqkv_ref[0, 0], preferred_element_type=jnp.float32) + bqkv[0:1, :]
    k = jnp.dot(hb, wqkv_ref[0, 1], preferred_element_type=jnp.float32) + bqkv[1:2, :]
    v = jnp.dot(hb, wqkv_ref[0, 2], preferred_element_type=jnp.float32) + bqkv[2:3, :]

    # ---- Head-batched attention: (H, S, dh) ---------------------------------
    qh = q.reshape(S, H, dh).transpose(1, 0, 2).astype(jnp.bfloat16)
    kh = k.reshape(S, H, dh).transpose(1, 0, 2).astype(jnp.bfloat16)
    vh = v.reshape(S, H, dh).transpose(1, 0, 2).astype(jnp.bfloat16)

    s = jnp.einsum('hqd,hkd->hqk', qh, kh,
                   preferred_element_type=jnp.float32) * scale
    s = s - jnp.max(s, axis=-1, keepdims=True)
    p = jnp.exp(s)
    p = p * pl.reciprocal(jnp.sum(p, axis=-1, keepdims=True), approx=True)
    ctx = jnp.einsum('hqk,hkd->hqd', p.astype(jnp.bfloat16), vh,
                     preferred_element_type=jnp.float32)          # (H, S, dh)
    ctx = ctx.transpose(1, 0, 2).reshape(S, E)                     # concat heads

    # Single full-width out-projection.
    attn = jnp.dot(ctx.astype(jnp.bfloat16), wo_ref[0],
                   preferred_element_type=jnp.float32) + bo_ref[0]
    x = x + attn                                        # residual (dropout = id)

    # ---- LayerNorm 2 + MLP --------------------------------------------------
    h2 = _layer_norm(x, ln2g_ref[0], ln2b_ref[0]).astype(jnp.bfloat16)
    m = jnp.dot(h2, w1_ref[0], preferred_element_type=jnp.float32) + b1_ref[0]
    m = _gelu(m)
    m = jnp.dot(m.astype(jnp.bfloat16), w2_ref[0],
                preferred_element_type=jnp.float32) + b2_ref[0]
    x = x + m                                           # residual (dropout = id)

    # Keep residual stream resident for the next layer.
    xres_ref[...] = x

    # Last layer: flush to the output block for this batch element.
    @pl.when(d_idx == pl.num_programs(1) - 1)
    def _():
        out_ref[...] = x.reshape(1, S, E).astype(out_ref.dtype)


# ---------------------------------------------------------------------------
# Wrapper
# ---------------------------------------------------------------------------
def encoder_forward(x, params, num_heads):
    B, S, E = x.shape
    depth = params['wqkv'].shape[0]
    mlp = params['w1'].shape[-1]
    kernel = functools.partial(encoder_kernel, num_heads=num_heads)

    def wspec(tail):
        n = len(tail)
        # Per-layer weight tile: picks layer `d`, ignores batch index `b`.
        return pl.BlockSpec((1,) + tail, lambda b, d, _n=n: (d,) + (0,) * _n)

    in_specs = [
        pl.BlockSpec((1, S, E), lambda b, d: (b, 0, 0)),   # x
        wspec((1, E)), wspec((1, E)),                      # ln1 gamma/beta
        wspec((3, E, E)), wspec((3, E)),                   # wqkv, bqkv
        wspec((E, E)), wspec((1, E)),                      # wo, bo
        wspec((1, E)), wspec((1, E)),                      # ln2 gamma/beta
        wspec((E, mlp)), wspec((1, mlp)),                  # w1, b1
        wspec((mlp, E)), wspec((1, E)),                    # w2, b2
    ]

    grid_spec = pltpu.PrefetchScalarGridSpec(
        num_scalar_prefetch=0,
        grid=(B, depth),
        in_specs=in_specs,
        out_specs=pl.BlockSpec((1, S, E), lambda b, d: (b, 0, 0)),
        scratch_shapes=[pltpu.VMEM((S, E), jnp.float32)],  # residual stream
    )

    return pl.pallas_call(
        kernel,
        out_shape=jax.ShapeDtypeStruct((B, S, E), x.dtype),
        grid_spec=grid_spec,
        compiler_params=pltpu.CompilerParams(
            dimension_semantics=("parallel", "arbitrary"),
            vmem_limit_bytes=48 * 1024 * 1024,
        ),
    )(x,
      params['ln1_g'], params['ln1_b'],
      params['wqkv'], params['bqkv'], params['wo'], params['bo'],
      params['ln2_g'], params['ln2_b'],
      params['w1'], params['b1'], params['w2'], params['b2'])


def init_params(key, depth, emb_dim, num_heads, mlp_dim):
    """Deterministic synthetic parameters, stacked along a leading depth axis.

    Weights are pre-transposed so the kernel computes y = x @ W + b:
      wqkv[d, i] = in_proj_weight[i*E:(i+1)*E].T  (i in {q,k,v}) : (E, E)
      wo[d]      = out_proj.weight.T                              : (E, E)
      w1[d]      = fc1.weight.T                                   : (E, mlp)
      w2[d]      = fc2.weight.T                                   : (mlp, E)
    Matmul weights are stored in bfloat16 (f32 accumulation in-kernel);
    LayerNorm params and biases stay f32.
    """
    ks = jax.random.split(key, 4)
    E, M = emb_dim, mlp_dim
    return {
        'ln1_g': jnp.ones((depth, 1, E), jnp.float32),
        'ln1_b': jnp.zeros((depth, 1, E), jnp.float32),
        'wqkv': (0.02 * jax.random.normal(ks[0], (depth, 3, E, E),
                                          jnp.float32)).astype(jnp.bfloat16),
        'bqkv': jnp.zeros((depth, 3, E), jnp.float32),
        'wo': (0.02 * jax.random.normal(ks[1], (depth, E, E),
                                        jnp.float32)).astype(jnp.bfloat16),
        'bo': jnp.zeros((depth, 1, E), jnp.float32),
        'ln2_g': jnp.ones((depth, 1, E), jnp.float32),
        'ln2_b': jnp.zeros((depth, 1, E), jnp.float32),
        'w1': (0.02 * jax.random.normal(ks[2], (depth, E, M),
                                        jnp.float32)).astype(jnp.bfloat16),
        'b1': jnp.zeros((depth, 1, M), jnp.float32),
        'w2': (0.02 * jax.random.normal(ks[3], (depth, M, E),
                                        jnp.float32)).astype(jnp.bfloat16),
        'b2': jnp.zeros((depth, 1, E), jnp.float32),
    }


if __name__ == "__main__":
    # Small, lane-dense config: E and mlp_dim are multiples of 128.
    depth, emb_dim, num_heads, mlp_dim = 2, 128, 4, 256
    B, S = 2, 8

    key = jax.random.PRNGKey(0)
    kx, kp = jax.random.split(key)
    x = jax.random.normal(kx, (B, S, emb_dim), jnp.float32)
    params = init_params(kp, depth, emb_dim, num_heads, mlp_dim)

    out = jax.jit(functools.partial(encoder_forward, num_heads=num_heads))(
        x, params)
    jax.block_until_ready(out)
    assert out.shape == (B, S, emb_dim)
    print("KERNEL_OK")
</pallas_src>

<mosaic_0001>
module attributes {stable_mosaic.version = 11 : i64} {
  func.func @encoder_kernel(%arg0: i32, %arg1: i32, %arg2: memref<1x8x128xf32, #tpu.memory_space<vmem>>, %arg3: memref<1x1x128xf32, #tpu.memory_space<vmem>>, %arg4: memref<1x1x128xf32, #tpu.memory_space<vmem>>, %arg5: memref<1x3x128x128xbf16, #tpu.memory_space<vmem>>, %arg6: memref<1x3x128xf32, #tpu.memory_space<vmem>>, %arg7: memref<1x128x128xbf16, #tpu.memory_space<vmem>>, %arg8: memref<1x1x128xf32, #tpu.memory_space<vmem>>, %arg9: memref<1x1x128xf32, #tpu.memory_space<vmem>>, %arg10: memref<1x1x128xf32, #tpu.memory_space<vmem>>, %arg11: memref<1x128x256xbf16, #tpu.memory_space<vmem>>, %arg12: memref<1x1x256xf32, #tpu.memory_space<vmem>>, %arg13: memref<1x256x128xbf16, #tpu.memory_space<vmem>>, %arg14: memref<1x1x128xf32, #tpu.memory_space<vmem>>, %arg15: memref<1x8x128xf32, #tpu.memory_space<vmem>>, %arg16: memref<8x128xf32, #tpu.memory_space<vmem>>) attributes {dimension_semantics = [#tpu.dimension_semantics<parallel>, #tpu.dimension_semantics<arbitrary>], iteration_bounds = array<i64: 2, 2>, scalar_prefetch = 0 : i64, scratch_operands = 1 : i64, tpu.core_type = #tpu.core_type<tc>, window_params = [{transform_indices = @transform_0, window_bounds = array<i64: 1, 8, 128>}, {transform_indices = @transform_1, window_bounds = array<i64: 1, 1, 128>}, {transform_indices = @transform_2, window_bounds = array<i64: 1, 1, 128>}, {transform_indices = @transform_3, window_bounds = array<i64: 1, 3, 128, 128>}, {transform_indices = @transform_4, window_bounds = array<i64: 1, 3, 128>}, {transform_indices = @transform_5, window_bounds = array<i64: 1, 128, 128>}, {transform_indices = @transform_6, window_bounds = array<i64: 1, 1, 128>}, {transform_indices = @transform_7, window_bounds = array<i64: 1, 1, 128>}, {transform_indices = @transform_8, window_bounds = array<i64: 1, 1, 128>}, {transform_indices = @transform_9, window_bounds = array<i64: 1, 128, 256>}, {transform_indices = @transform_10, window_bounds = array<i64: 1, 1, 256>}, {transform_indices = @transform_11, window_bounds = array<i64: 1, 256, 128>}, {transform_indices = @transform_12, window_bounds = array<i64: 1, 1, 128>}, {transform_indices = @transform_13, window_bounds = array<i64: 1, 8, 128>}]} {
    %c0_i32 = arith.constant 0 : i32
    %0 = arith.cmpi eq, %arg1, %c0_i32 : i32
    %1 = arith.extui %0 : i1 to i32
    %c0_i32_0 = arith.constant 0 : i32
    %2 = arith.cmpi ne, %1, %c0_i32_0 : i32
    scf.if %2 {
      %c0_72 = arith.constant 0 : index
      %c0_73 = arith.constant 0 : index
      %c0_74 = arith.constant 0 : index
      %146 = vector.load %arg2[%c0_72, %c0_73, %c0_74] : memref<1x8x128xf32, #tpu.memory_space<vmem>>, vector<1x8x128xf32>
      %147 = vector.shape_cast %146 : vector<1x8x128xf32> to vector<8x128xf32>
      %c0_75 = arith.constant 0 : index
      %c0_76 = arith.constant 0 : index
      %148 = vector.load %arg16[%c0_75, %c0_76] : memref<8x128xf32, #tpu.memory_space<vmem>>, vector<8x128xf32>
      tpu.vector_store %arg16[%c0_75, %c0_76], %147 {strides = array<i32>} : memref<8x128xf32, #tpu.memory_space<vmem>>, vector<8x128xf32>,
    } else {
    }
    %c0 = arith.constant 0 : index
    %c0_1 = arith.constant 0 : index
    %3 = vector.load %arg16[%c0, %c0_1] : memref<8x128xf32, #tpu.memory_space<vmem>>, vector<8x128xf32>
    %c0_2 = arith.constant 0 : index
    %c0_3 = arith.constant 0 : index
    %c0_4 = arith.constant 0 : index
    %4 = vector.load %arg3[%c0_2, %c0_3, %c0_4] : memref<1x1x128xf32, #tpu.memory_space<vmem>>, vector<1x1x128xf32>
    %5 = vector.shape_cast %4 : vector<1x1x128xf32> to vector<1x128xf32>
    %c0_5 = arith.constant 0 : index
    %c0_6 = arith.constant 0 : index
    %c0_7 = arith.constant 0 : index
    %6 = vector.load %arg4[%c0_5, %c0_6, %c0_7] : memref<1x1x128xf32, #tpu.memory_space<vmem>>, vector<1x1x128xf32>
    %7 = vector.shape_cast %6 : vector<1x1x128xf32> to vector<1x128xf32>
    %cst = arith.constant dense<0.000000e+00> : vector<8xf32>
    %8 = vector.multi_reduction <add>, %3, %cst [1] : vector<8x128xf32> to vector<8xf32>
    %9 = vector.shape_cast %8 : vector<8xf32> to vector<8x1xf32>
    %cst_8 = arith.constant 1.280000e+02 : f32
    %10 = vector.broadcast %cst_8 : f32 to vector<8x1xf32>
    %11 = arith.divf %9, %10 : vector<8x1xf32>
    %12 = vector.broadcast %11 : vector<8x1xf32> to vector<8x128xf32>
    %13 = arith.subf %3, %12 : vector<8x128xf32>
    %14 = arith.mulf %13, %13 : vector<8x128xf32>
    %cst_9 = arith.constant dense<0.000000e+00> : vector<8xf32>
    %15 = vector.multi_reduction <add>, %14, %cst_9 [1] : vector<8x128xf32> to vector<8xf32>
    %16 = vector.shape_cast %15 : vector<8xf32> to vector<8x1xf32>
    %cst_10 = arith.constant 1.280000e+02 : f32
    %17 = vector.broadcast %cst_10 : f32 to vector<8x1xf32>
    %18 = arith.divf %16, %17 : vector<8x1xf32>
    %19 = vector.broadcast %11 : vector<8x1xf32> to vector<8x128xf32>
    %20 = arith.subf %3, %19 : vector<8x128xf32>
    %cst_11 = arith.constant 9.99999974E-6 : f32
    %21 = vector.broadcast %cst_11 : f32 to vector<8x1xf32>
    %22 = arith.addf %18, %21 : vector<8x1xf32>
    %23 = math.rsqrt %22 : vector<8x1xf32>
    %24 = vector.broadcast %23 : vector<8x1xf32> to vector<8x128xf32>
    %25 = arith.mulf %20, %24 : vector<8x128xf32>
    %26 = vector.broadcast %5 : vector<1x128xf32> to vector<8x128xf32>
    %27 = arith.mulf %25, %26 : vector<8x128xf32>
    %28 = vector.broadcast %7 : vector<1x128xf32> to vector<8x128xf32>
    %29 = arith.addf %27, %28 : vector<8x128xf32>
    %30 = arith.truncf %29 : vector<8x128xf32> to vector<8x128xbf16>
    %c0_12 = arith.constant 0 : index
    %c0_13 = arith.constant 0 : index
    %c0_14 = arith.constant 0 : index
    %31 = vector.load %arg6[%c0_12, %c0_13, %c0_14] : memref<1x3x128xf32, #tpu.memory_space<vmem>>, vector<1x3x128xf32>
    %32 = vector.shape_cast %31 : vector<1x3x128xf32> to vector<3x128xf32>
    %c0_15 = arith.constant 0 : index
    %c0_16 = arith.constant 0 : index
    %c0_17 = arith.constant 0 : index
    %c0_18 = arith.constant 0 : index
    %33 = vector.load %arg5[%c0_15, %c0_16, %c0_17, %c0_18] : memref<1x3x128x128xbf16, #tpu.memory_space<vmem>>, vector<1x1x128x128xbf16>
    %34 = vector.shape_cast %33 : vector<1x1x128x128xbf16> to vector<128x128xbf16>
    %cst_19 = arith.constant dense<0.000000e+00> : vector<8x128xf32>
    %35 = tpu.matmul %30, %34, %cst_19 {dimension_numbers = #tpu.dot_dimension_numbers<[1], [0], [0], [1], [0, 0, 1, 1], [], []>} : vector<8x128xbf16>, vector<128x128xbf16>, vector<8x128xf32> -> vector<8x128xf32>
    %36 = vector.extract_strided_slice %32 {offsets = [0, 0], sizes = [1, 128], strides = [1, 1]} : vector<3x128xf32> to vector<1x128xf32>
    %37 = vector.broadcast %36 : vector<1x128xf32> to vector<8x128xf32>
    %38 = arith.addf %35, %37 : vector<8x128xf32>
    %c0_20 = arith.constant 0 : index
    %c1 = arith.constant 1 : index
    %c0_21 = arith.constant 0 : index
    %c0_22 = arith.constant 0 : index
    %39 = vector.load %arg5[%c0_20, %c1, %c0_21, %c0_22] : memref<1x3x128x128xbf16, #tpu.memory_space<vmem>>, vector<1x1x128x128xbf16>
    %40 = vector.shape_cast %39 : vector<1x1x128x128xbf16> to vector<128x128xbf16>
    %cst_23 = arith.constant dense<0.000000e+00> : vector<8x128xf32>
    %41 = tpu.matmul %30, %40, %cst_23 {dimension_numbers = #tpu.dot_dimension_numbers<[1], [0], [0], [1], [0, 0, 1, 1], [], []>} : vector<8x128xbf16>, vector<128x128xbf16>, vector<8x128xf32> -> vector<8x128xf32>
    %42 = vector.extract_strided_slice %32 {offsets = [1, 0], sizes = [1, 128], strides = [1, 1]} : vector<3x128xf32> to vector<1x128xf32>
    %43 = vector.broadcast %42 : vector<1x128xf32> to vector<8x128xf32>
    %44 = arith.addf %41, %43 : vector<8x128xf32>
    %c0_24 = arith.constant 0 : index
    %c2 = arith.constant 2 : index
    %c0_25 = arith.constant 0 : index
    %c0_26 = arith.constant 0 : index
    %45 = vector.load %arg5[%c0_24, %c2, %c0_25, %c0_26] : memref<1x3x128x128xbf16, #tpu.memory_space<vmem>>, vector<1x1x128x128xbf16>
    %46 = vector.shape_cast %45 : vector<1x1x128x128xbf16> to vector<128x128xbf16>
    %cst_27 = arith.constant dense<0.000000e+00> : vector<8x128xf32>
    %47 = tpu.matmul %30, %46, %cst_27 {dimension_numbers = #tpu.dot_dimension_numbers<[1], [0], [0], [1], [0, 0, 1, 1], [], []>} : vector<8x128xbf16>, vector<128x128xbf16>, vector<8x128xf32> -> vector<8x128xf32>
    %48 = vector.extract_strided_slice %32 {offsets = [2, 0], sizes = [1, 128], strides = [1, 1]} : vector<3x128xf32> to vector<1x128xf32>
    %49 = vector.broadcast %48 : vector<1x128xf32> to vector<8x128xf32>
    %50 = arith.addf %47, %49 : vector<8x128xf32>
    %51 = vector.shape_cast %38 : vector<8x128xf32> to vector<8x4x32xf32>
    %52 = tpu.transpose %51, [1, 0, 2] : vector<8x4x32xf32> -> vector<4x8x32xf32>
    %53 = arith.truncf %52 : vector<4x8x32xf32> to vector<4x8x32xbf16>
    %54 = vector.shape_cast %44 : vector<8x128xf32> to vector<8x4x32xf32>
    %55 = tpu.transpose %54, [1, 0, 2] : vector<8x4x32xf32> -> vector<4x8x32xf32>
    %56 = arith.truncf %55 : vector<4x8x32xf32> to vector<4x8x32xbf16>
    %57 = vector.shape_cast %50 : vector<8x128xf32> to vector<8x4x32xf32>
    %58 = tpu.transpose %57, [1, 0, 2] : vector<8x4x32xf32> -> vector<4x8x32xf32>
    %59 = arith.truncf %58 : vector<4x8x32xf32> to vector<4x8x32xbf16>
    "tpu.trace_start"() <{level = 10 : i32, message = "hqd,hkd->hqk"}> : () -> ()
    %cst_28 = arith.constant dense<0.000000e+00> : vector<4x8x8xf32>
    %60 = tpu.matmul %53, %56, %cst_28 {dimension_numbers = #tpu.dot_dimension_numbers<[2], [2], [1], [1], [0, 0, 0, 1, 1, 1], [0], [0]>} : vector<4x8x32xbf16>, vector<4x8x32xbf16>, vector<4x8x8xf32> -> vector<4x8x8xf32>
    "tpu.trace_stop"() : () -> ()
    %cst_29 = arith.constant 0.176776692 : f32
    %61 = vector.broadcast %cst_29 : f32 to vector<4x8x8xf32>
    %62 = arith.mulf %60, %61 : vector<4x8x8xf32>
    %cst_30 = arith.constant dense<0xFF800000> : vector<4x8xf32>
    %63 = vector.multi_reduction <maximumf>, %62, %cst_30 [2] : vector<4x8x8xf32> to vector<4x8xf32>
    %64 = vector.shape_cast %63 : vector<4x8xf32> to vector<4x8x1xf32>
    %65 = vector.broadcast %64 : vector<4x8x1xf32> to vector<4x8x8xf32>
    %66 = arith.subf %62, %65 : vector<4x8x8xf32>
    %67 = math.exp %66 : vector<4x8x8xf32>
    %cst_31 = arith.constant dense<0.000000e+00> : vector<4x8xf32>
    %68 = vector.multi_reduction <add>, %67, %cst_31 [2] : vector<4x8x8xf32> to vector<4x8xf32>
    %69 = vector.shape_cast %68 : vector<4x8xf32> to vector<4x8x1xf32>
    %70 = tpu.reciprocal %69 {approx = true} : vector<4x8x1xf32> -> vector<4x8x1xf32>
    %71 = vector.broadcast %70 : vector<4x8x1xf32> to vector<4x8x8xf32>
    %72 = arith.mulf %67, %71 : vector<4x8x8xf32>
    %73 = arith.truncf %72 : vector<4x8x8xf32> to vector<4x8x8xbf16>
    "tpu.trace_start"() <{level = 10 : i32, message = "hqk,hkd->hqd"}> : () -> ()
    %cst_32 = arith.constant dense<0.000000e+00> : vector<4x8x32xf32>
    %74 = tpu.matmul %73, %59, %cst_32 {dimension_numbers = #tpu.dot_dimension_numbers<[2], [1], [1], [2], [0, 0, 0, 1, 1, 2], [0], [0]>} : vector<4x8x8xbf16>, vector<4x8x32xbf16>, vector<4x8x32xf32> -> vector<4x8x32xf32>
    "tpu.trace_stop"() : () -> ()
    %75 = tpu.transpose %74, [1, 0, 2] : vector<4x8x32xf32> -> vector<8x4x32xf32>
    %76 = vector.shape_cast %75 : vector<8x4x32xf32> to vector<8x128xf32>
    %77 = arith.truncf %76 : vector<8x128xf32> to vector<8x128xbf16>
    %c0_33 = arith.constant 0 : index
    %c0_34 = arith.constant 0 : index
    %c0_35 = arith.constant 0 : index
    %78 = vector.load %arg7[%c0_33, %c0_34, %c0_35] : memref<1x128x128xbf16, #tpu.memory_space<vmem>>, vector<1x128x128xbf16>
    %79 = vector.shape_cast %78 : vector<1x128x128xbf16> to vector<128x128xbf16>
    %cst_36 = arith.constant dense<0.000000e+00> : vector<8x128xf32>
    %80 = tpu.matmul %77, %79, %cst_36 {dimension_numbers = #tpu.dot_dimension_numbers<[1], [0], [0], [1], [0, 0, 1, 1], [], []>} : vector<8x128xbf16>, vector<128x128xbf16>, vector<8x128xf32> -> vector<8x128xf32>
    %c0_37 = arith.constant 0 : index
    %c0_38 = arith.constant 0 : index
    %c0_39 = arith.constant 0 : index
    %81 = vector.load %arg8[%c0_37, %c0_38, %c0_39] : memref<1x1x128xf32, #tpu.memory_space<vmem>>, vector<1x1x128xf32>
    %82 = vector.shape_cast %81 : vector<1x1x128xf32> to vector<1x128xf32>
    %83 = vector.broadcast %82 : vector<1x128xf32> to vector<8x128xf32>
    %84 = arith.addf %80, %83 : vector<8x128xf32>
    %85 = arith.addf %3, %84 : vector<8x128xf32>
    %c0_40 = arith.constant 0 : index
    %c0_41 = arith.constant 0 : index
    %c0_42 = arith.constant 0 : index
    %86 = vector.load %arg9[%c0_40, %c0_41, %c0_42] : memref<1x1x128xf32, #tpu.memory_space<vmem>>, vector<1x1x128xf32>
    %87 = vector.shape_cast %86 : vector<1x1x128xf32> to vector<1x128xf32>
    %c0_43 = arith.constant 0 : index
    %c0_44 = arith.constant 0 : index
    %c0_45 = arith.constant 0 : index
    %88 = vector.load %arg10[%c0_43, %c0_44, %c0_45] : memref<1x1x128xf32, #tpu.memory_space<vmem>>, vector<1x1x128xf32>
    %89 = vector.shape_cast %88 : vector<1x1x128xf32> to vector<1x128xf32>
    %cst_46 = arith.constant dense<0.000000e+00> : vector<8xf32>
    %90 = vector.multi_reduction <add>, %85, %cst_46 [1] : vector<8x128xf32> to vector<8xf32>
    %91 = vector.shape_cast %90 : vector<8xf32> to vector<8x1xf32>
    %cst_47 = arith.constant 1.280000e+02 : f32
    %92 = vector.broadcast %cst_47 : f32 to vector<8x1xf32>
    %93 = arith.divf %91, %92 : vector<8x1xf32>
    %94 = vector.broadcast %93 : vector<8x1xf32> to vector<8x128xf32>
    %95 = arith.subf %85, %94 : vector<8x128xf32>
    %96 = arith.mulf %95, %95 : vector<8x128xf32>
    %cst_48 = arith.constant dense<0.000000e+00> : vector<8xf32>
    %97 = vector.multi_reduction <add>, %96, %cst_48 [1] : vector<8x128xf32> to vector<8xf32>
    %98 = vector.shape_cast %97 : vector<8xf32> to vector<8x1xf32>
    %cst_49 = arith.constant 1.280000e+02 : f32
    %99 = vector.broadcast %cst_49 : f32 to vector<8x1xf32>
    %100 = arith.divf %98, %99 : vector<8x1xf32>
    %101 = vector.broadcast %93 : vector<8x1xf32> to vector<8x128xf32>
    %102 = arith.subf %85, %101 : vector<8x128xf32>
    %cst_50 = arith.constant 9.99999974E-6 : f32
    %103 = vector.broadcast %cst_50 : f32 to vector<8x1xf32>
    %104 = arith.addf %100, %103 : vector<8x1xf32>
    %105 = math.rsqrt %104 : vector<8x1xf32>
    %106 = vector.broadcast %105 : vector<8x1xf32> to vector<8x128xf32>
    %107 = arith.mulf %102, %106 : vector<8x128xf32>
    %108 = vector.broadcast %87 : vector<1x128xf32> to vector<8x128xf32>
    %109 = arith.mulf %107, %108 : vector<8x128xf32>
    %110 = vector.broadcast %89 : vector<1x128xf32> to vector<8x128xf32>
    %111 = arith.addf %109, %110 : vector<8x128xf32>
    %112 = arith.truncf %111 : vector<8x128xf32> to vector<8x128xbf16>
    %c0_51 = arith.constant 0 : index
    %c0_52 = arith.constant 0 : index
    %c0_53 = arith.constant 0 : index
    %113 = vector.load %arg11[%c0_51, %c0_52, %c0_53] : memref<1x128x256xbf16, #tpu.memory_space<vmem>>, vector<1x128x256xbf16>
    %114 = vector.shape_cast %113 : vector<1x128x256xbf16> to vector<128x256xbf16>
    %cst_54 = arith.constant dense<0.000000e+00> : vector<8x256xf32>
    %115 = tpu.matmul %112, %114, %cst_54 {dimension_numbers = #tpu.dot_dimension_numbers<[1], [0], [0], [1], [0, 0, 1, 1], [], []>} : vector<8x128xbf16>, vector<128x256xbf16>, vector<8x256xf32> -> vector<8x256xf32>
    %c0_55 = arith.constant 0 : index
    %c0_56 = arith.constant 0 : index
    %c0_57 = arith.constant 0 : index
    %116 = vector.load %arg12[%c0_55, %c0_56, %c0_57] : memref<1x1x256xf32, #tpu.memory_space<vmem>>, vector<1x1x256xf32>
    %117 = vector.shape_cast %116 : vector<1x1x256xf32> to vector<1x256xf32>
    %118 = vector.broadcast %117 : vector<1x256xf32> to vector<8x256xf32>
    %119 = arith.addf %115, %118 : vector<8x256xf32>
    %cst_58 = arith.constant 5.000000e-01 : f32
    %120 = vector.broadcast %cst_58 : f32 to vector<8x256xf32>
    %121 = arith.mulf %120, %119 : vector<8x256xf32>
    %cst_59 = arith.constant 4.471500e-02 : f32
    %122 = vector.broadcast %cst_59 : f32 to vector<8x256xf32>
    %123 = arith.mulf %122, %119 : vector<8x256xf32>
    %124 = arith.mulf %123, %119 : vector<8x256xf32>
    %125 = arith.mulf %124, %119 : vector<8x256xf32>
    %126 = arith.addf %119, %125 : vector<8x256xf32>
    %cst_60 = arith.constant 0.797884583 : f32
    %127 = vector.broadcast %cst_60 : f32 to vector<8x256xf32>
    %128 = arith.mulf %127, %126 : vector<8x256xf32>
    %129 = math.tanh %128 : vector<8x256xf32>
    %cst_61 = arith.constant 1.000000e+00 : f32
    %130 = vector.broadcast %cst_61 : f32 to vector<8x256xf32>
    %131 = arith.addf %130, %129 : vector<8x256xf32>
    %132 = arith.mulf %121, %131 : vector<8x256xf32>
    %133 = arith.truncf %132 : vector<8x256xf32> to vector<8x256xbf16>
    %c0_62 = arith.constant 0 : index
    %c0_63 = arith.constant 0 : index
    %c0_64 = arith.constant 0 : index
    %134 = vector.load %arg13[%c0_62, %c0_63, %c0_64] : memref<1x256x128xbf16, #tpu.memory_space<vmem>>, vector<1x256x128xbf16>
    %135 = vector.shape_cast %134 : vector<1x256x128xbf16> to vector<256x128xbf16>
    %cst_65 = arith.constant dense<0.000000e+00> : vector<8x128xf32>
    %136 = tpu.matmul %133, %135, %cst_65 {dimension_numbers = #tpu.dot_dimension_numbers<[1], [0], [0], [1], [0, 0, 1, 1], [], []>} : vector<8x256xbf16>, vector<256x128xbf16>, vector<8x128xf32> -> vector<8x128xf32>
    %c0_66 = arith.constant 0 : index
    %c0_67 = arith.constant 0 : index
    %c0_68 = arith.constant 0 : index
    %137 = vector.load %arg14[%c0_66, %c0_67, %c0_68] : memref<1x1x128xf32, #tpu.memory_space<vmem>>, vector<1x1x128xf32>
    %138 = vector.shape_cast %137 : vector<1x1x128xf32> to vector<1x128xf32>
    %139 = vector.broadcast %138 : vector<1x128xf32> to vector<8x128xf32>
    %140 = arith.addf %136, %139 : vector<8x128xf32>
    %141 = arith.addf %85, %140 : vector<8x128xf32>
    %c0_69 = arith.constant 0 : index
    %c0_70 = arith.constant 0 : index
    %142 = vector.load %arg16[%c0_69, %c0_70] : memref<8x128xf32, #tpu.memory_space<vmem>>, vector<8x128xf32>
    tpu.vector_store %arg16[%c0_69, %c0_70], %141 {strides = array<i32>} : memref<8x128xf32, #tpu.memory_space<vmem>>, vector<8x128xf32>,
    %c1_i32 = arith.constant 1 : i32
    %143 = arith.cmpi eq, %arg1, %c1_i32 : i32
    %144 = arith.extui %143 : i1 to i32
    %c0_i32_71 = arith.constant 0 : i32
    %145 = arith.cmpi ne, %144, %c0_i32_71 : i32
    scf.if %145 {
      %146 = vector.shape_cast %141 : vector<8x128xf32> to vector<1x8x128xf32>
      %c0_72 = arith.constant 0 : index
      %c0_73 = arith.constant 0 : index
      %c0_74 = arith.constant 0 : index
      %147 = vector.load %arg15[%c0_72, %c0_73, %c0_74] : memref<1x8x128xf32, #tpu.memory_space<vmem>>, vector<1x8x128xf32>
      tpu.vector_store %arg15[%c0_72, %c0_73, %c0_74], %146 {strides = array<i32>} : memref<1x8x128xf32, #tpu.memory_space<vmem>>, vector<1x8x128xf32>,
    } else {
    }
    return
  }
  func.func @transform_0(%arg0: i32, %arg1: i32) -> (i32, i32, i32) {
    %c0_i32 = arith.constant 0 : i32
    %c0_i32_0 = arith.constant 0 : i32
    %c0_i32_1 = arith.constant 0 : i32
    return %arg0, %c0_i32, %c0_i32_0 : i32, i32, i32
  }
  func.func @transform_1(%arg0: i32, %arg1: i32) -> (i32, i32, i32) {
    %c0_i32 = arith.constant 0 : i32
    %c0_i32_0 = arith.constant 0 : i32
    %c0_i32_1 = arith.constant 0 : i32
    return %arg1, %c0_i32, %c0_i32_0 : i32, i32, i32
  }
  func.func @transform_2(%arg0: i32, %arg1: i32) -> (i32, i32, i32) {
    %c0_i32 = arith.constant 0 : i32
    %c0_i32_0 = arith.constant 0 : i32
    %c0_i32_1 = arith.constant 0 : i32
    return %arg1, %c0_i32, %c0_i32_0 : i32, i32, i32
  }
  func.func @transform_3(%arg0: i32, %arg1: i32) -> (i32, i32, i32, i32) {
    %c0_i32 = arith.constant 0 : i32
    %c0_i32_0 = arith.constant 0 : i32
    %c0_i32_1 = arith.constant 0 : i32
    %c0_i32_2 = arith.constant 0 : i32
    return %arg1, %c0_i32, %c0_i32_0, %c0_i32_1 : i32, i32, i32, i32
  }
  func.func @transform_4(%arg0: i32, %arg1: i32) -> (i32, i32, i32) {
    %c0_i32 = arith.constant 0 : i32
    %c0_i32_0 = arith.constant 0 : i32
    %c0_i32_1 = arith.constant 0 : i32
    return %arg1, %c0_i32, %c0_i32_0 : i32, i32, i32
  }
  func.func @transform_5(%arg0: i32, %arg1: i32) -> (i32, i32, i32) {
    %c0_i32 = arith.constant 0 : i32
    %c0_i32_0 = arith.constant 0 : i32
    %c0_i32_1 = arith.constant 0 : i32
    return %arg1, %c0_i32, %c0_i32_0 : i32, i32, i32
  }
  func.func @transform_6(%arg0: i32, %arg1: i32) -> (i32, i32, i32) {
    %c0_i32 = arith.constant 0 : i32
    %c0_i32_0 = arith.constant 0 : i32
    %c0_i32_1 = arith.constant 0 : i32
    return %arg1, %c0_i32, %c0_i32_0 : i32, i32, i32
  }
  func.func @transform_7(%arg0: i32, %arg1: i32) -> (i32, i32, i32) {
    %c0_i32 = arith.constant 0 : i32
    %c0_i32_0 = arith.constant 0 : i32
    %c0_i32_1 = arith.constant 0 : i32
    return %arg1, %c0_i32, %c0_i32_0 : i32, i32, i32
  }
  func.func @transform_8(%arg0: i32, %arg1: i32) -> (i32, i32, i32) {
    %c0_i32 = arith.constant 0 : i32
    %c0_i32_0 = arith.constant 0 : i32
    %c0_i32_1 = arith.constant 0 : i32
    return %arg1, %c0_i32, %c0_i32_0 : i32, i32, i32
  }
  func.func @transform_9(%arg0: i32, %arg1: i32) -> (i32, i32, i32) {
    %c0_i32 = arith.constant 0 : i32
    %c0_i32_0 = arith.constant 0 : i32
    %c0_i32_1 = arith.constant 0 : i32
    return %arg1, %c0_i32, %c0_i32_0 : i32, i32, i32
  }
  func.func @transform_10(%arg0: i32, %arg1: i32) -> (i32, i32, i32) {
    %c0_i32 = arith.constant 0 : i32
    %c0_i32_0 = arith.constant 0 : i32
    %c0_i32_1 = arith.constant 0 : i32
    return %arg1, %c0_i32, %c0_i32_0 : i32, i32, i32
  }
  func.func @transform_11(%arg0: i32, %arg1: i32) -> (i32, i32, i32) {
    %c0_i32 = arith.constant 0 : i32
    %c0_i32_0 = arith.constant 0 : i32
    %c0_i32_1 = arith.constant 0 : i32
    return %arg1, %c0_i32, %c0_i32_0 : i32, i32, i32
  }
  func.func @transform_12(%arg0: i32, %arg1: i32) -> (i32, i32, i32) {
    %c0_i32 = arith.constant 0 : i32
    %c0_i32_0 = arith.constant 0 : i32
    %c0_i32_1 = arith.constant 0 : i32
    return %arg1, %c0_i32, %c0_i32_0 : i32, i32, i32
  }
  func.func @transform_13(%arg0: i32, %arg1: i32) -> (i32, i32, i32) {
    %c0_i32 = arith.constant 0 : i32
    %c0_i32_0 = arith.constant 0 : i32
    %c0_i32_1 = arith.constant 0 : i32
    return %arg0, %c0_i32, %c0_i32_0 : i32, i32, i32
  }
}

</mosaic_0001>

<bundles_post_ra>
// kernel: encoder_forward.1
= control target key start
LH: loop header
LB: loop body
LE: loop exit
PB: predicated region body
PF: predicated region fallthrough
CT: control target
= control target key end

     0   :  { %s4588_s0 = inlined_call_operand.hbm [shape: f32[2,8,128], index: 0, kind: input, shape index: {}]   ;;  %s4589_s1 = inlined_call_operand.vmem [shape: f32[2,1,128], index: 1, kind: input, shape index: {}]   ;;  %s4590_s2 = inlined_call_operand.vmem [shape: f32[2,1,128], index: 2, kind: input, shape index: {}]   ;;  %s4591_s3 = inlined_call_operand.hbm [shape: bf16[2,3,128,128], index: 3, kind: input, shape index: {}]   ;;  %s4592_s4 = inlined_call_operand.vmem [shape: f32[2,3,128], index: 4, kind: input, shape index: {}]   ;;  %s4593_s5 = inlined_call_operand.hbm [shape: bf16[2,128,128], index: 5, kind: input, shape index: {}]   ;;  %s4594_s6 = inlined_call_operand.vmem [shape: f32[2,1,128], index: 6, kind: input, shape index: {}]   ;;  %s4595_s7 = inlined_call_operand.vmem [shape: f32[2,1,128], index: 7, kind: input, shape index: {}]   ;;  %s4596_s8 = inlined_call_operand.vmem [shape: f32[2,1,128], index: 8, kind: input, shape index: {}]   ;;  %s4597_s9 = inlined_call_operand.hbm [shape: bf16[2,128,256], index: 9, kind: input, shape index: {}]   ;;  %s4598_s10 = inlined_call_operand.vmem [shape: f32[2,1,256], index: 10, kind: input, shape index: {}]   ;;  %s4599_s11 = inlined_call_operand.hbm [shape: bf16[2,256,128], index: 11, kind: input, shape index: {}]   ;;  %s4600_s12 = inlined_call_operand.hbm [shape: f32[2,1,128], index: 12, kind: input, shape index: {}]   ;;  %s4601_s13 = inlined_call_operand.hbm [shape: f32[2,8,128], index: 13, kind: output, shape index: {}]  }
   0x1   :  { %4629 = sst [smem:[#allocation37_spill]] %s4588_s0 }
   0x2   :  { %4630 = sst [smem:[#allocation38_spill]] %s4589_s1 }
   0x3   :  { %4631 = sst [smem:[#allocation39_spill]] %s4590_s2 }
   0x4   :  { %4632 = sst [smem:[#allocation40_spill]] %s4591_s3 }
   0x5   :  { %4633 = sst [smem:[#allocation41_spill]] %s4592_s4 }
   0x6   :  { %4634 = sst [smem:[#allocation42_spill]] %s4593_s5 }
   0x7   :  { %4635 = sst [smem:[#allocation43_spill]] %s4594_s6 }
   0x8   :  { %4636 = sst [smem:[#allocation44_spill]] %s4595_s7 }
   0x9   :  { %4637 = sst [smem:[#allocation45_spill]] %s4596_s8 }
   0xa   :  { %4638 = sst [smem:[#allocation46_spill]] %s4597_s9 }
   0xb   :  { %4639 = sst [smem:[#allocation47_spill]] %s4598_s10 }
   0xc   :  { %4640 = sst [smem:[#allocation48_spill]] %s4599_s11 }
   0xd   :  { %4641 = sst [smem:[#allocation49_spill]] %s4600_s12 }
   0xe   :  { %4642 = sst [smem:[#allocation50_spill]] %s4601_s13 }
   0xf   :  { %18 = vsyncpa [#allocation4], 0 }
  0x10   :  { %20 = vsyncpa [#allocation4 + $0x1], 0 }
  0x11   :  { %21 = vsyncpa [#allocation7], 0 }
  0x12   :  { %23 = vsyncpa [#allocation7 + $0x1], 0 }
  0x13   :  { %24 = vsyncpa [#allocation10], 0 }
  0x14   :  { %26 = vsyncpa [#allocation10 + $0x1], 0 }
  0x15   :  { %27 = vsyncpa [#allocation13], 0 }
  0x16   :  { %29 = vsyncpa [#allocation13 + $0x1], 0 }
  0x17   :  { %30 = vsyncpa [#allocation5], 0 }
  0x18   :  { %32 = vsyncpa [#allocation5 + $0x1], 0  ;;  %s3896_s25 = smov 0   ;;  %s3898_s26 = smov 0  }
  0x19   :  { %s3900_s27 = smov 0   ;;  %s3902_s28 = smov 0  }
  0x1a   :  { %s3904_s29 = smov 0   ;;  %s3906_s30 = smov 0  }
  0x1b   :  { %s3908_s14 = smov 0   ;;  %s3910_s15 = smov 0  }
  0x1c   :  { %s3912_s16 = smov 0   ;;  %s3914_s17 = smov 0  }
  0x1d   :  { %s3916_s18 = smov 0  }
  0x1e LB: > { %4643 = sst [smem:[#allocation20_spill]] %s3769_s26  ;;  %p65_p0 = scmp.eq.s32.totalorder %s3805_s18, 0  ;;  %s3805_s18 = sphi %s3916_s18, %s38_s18   ;;  %s3801_s17 = sphi %s3914_s17, %s4718_s17   ;;  %s3797_s16 = sphi %s3912_s16, %s4717_s16   ;;  %s3793_s15 = sphi %s3910_s15, %s4716_s15   ;;  %s3789_s14 = sphi %s3908_s14, %s4715_s14   ;;  %s3785_s30 = sphi %s3906_s30, %s4714_s30   ;;  %s3781_s29 = sphi %s3904_s29, %s4713_s29   ;;  %s3777_s28 = sphi %s3902_s28, %s4712_s28   ;;  %s3773_s27 = sphi %s3900_s27, %s4711_s27   ;;  %s3769_s26 = sphi %s3898_s26, %s4710_s26   ;;  %s3765_s25 = sphi %s3896_s25, %s4709_s25  }
  0x1f   : > { %4644 = sst [smem:[#allocation21_spill]] %s3773_s27  ;;  %p142_p1 = scmp.ne.s32.totalorder %s3773_s27, %s3769_s26 }
  0x20   : > { %4645 = sst [smem:[#allocation22_spill]] %s3777_s28  ;;  %p4609_p2 = scmp.lt.s32.totalorder %s3805_s18, 4 }
  0x21   : > { %4646 = sst [smem:[#allocation23_spill]] %s3781_s29  ;;  %s4603_s20 = sand.u32 1, %s3805_s18  }
  0x22   : > { %4647 = sst [smem:[#allocation24_spill]] %s3785_s30  ;;  %p144_p3 = por %p142_p1, %p65_p0 }
  0x23   : > { %4648 = sst [smem:[#allocation25_spill]] %s3789_s14  ;;  %s3960_s21 = sand.u32 1, %s3773_s27  }
  0x24   : > { %4649 = sst [smem:[#allocation26_spill]] %s3793_s15  ;;  %s3267_s22 = smul.u32 3072, %s3797_s16 }
  0x25   : > { %4650 = sst [smem:[#allocation27_spill]] %s3797_s16  ;;  %s3266_s23 = smul.u32 192, %s3960_s21 }
  0x26   : > { %4651 = sst [smem:[#allocation28_spill]] %s3801_s17  ;;  %p3966_p4 = pnand %p4609_p2, %p144_p3 }
  0x27   : > { %4652 = sst [smem:[#allocation29_spill]] %s3805_s18  ;;  %s466_s10 = scalar_lea.vmem [#allocation6], %s3266_s23 }
  0x28   : > { %s4654_s3 = sld [smem:[#allocation40_spill]]  ;;  %s473_s8 = sshll.u32 %s466_s10, 4  ;;  %s474_s8 = int_to_ptr.vmem [resolvable:$true] %s473_s8 }
  0x29   : > { %p2929_p5 = scmp.ge.s32.totalorder %s3805_s18, 1  ;;  %s3976_s7 = scalar_lea.sflag [#allocation7], %s4603_s20 }
  0x2a   : > { %p3980_p6 = pneg %p3966_p4  ;;  %s3518_s6 = scalar_lea.vmem %s474_s8, 3072 }
  0x2b   : > { %p3519_p7 = scmp.ne.s32.totalorder %s474_s8, %s3518_s6  ;;  %s3807_s13 = smov [#allocation6]  }
  0x2c   : > { %s3523_s15 = sshll.u32 %s3807_s13, 4  ;;  %s3524_s15 = int_to_ptr.vmem [resolvable:$false] %s3523_s15 }
  0x2d   : > { %p3521_p8 = pnand %p3519_p7, %p3980_p6  ;;  %s3525_s10 = scalar_lea.vmem %s3524_s15, 6144 }
  0x2e   : > { %s472_s19 = scalar_lea.hbm %s4654_s3, %s3267_s22  ;;  %p3526_p10 = scmp.lt.s32.totalorder %s474_s8, %s3524_s15 }
  0x2f   : > { %p3522_p9 = pneg %p3521_p8  ;;  %p3527_p11 = scmp.lt.s32.totalorder %s3525_s10, %s3518_s6 }
  0x31   : > { %p3528_p12 = por %p3527_p11, %p3526_p10 }
  0x33   : > { %p3529_p13 = pnand %p3528_p12, %p3522_p9 }
  0x35   : > { %3532 = shalt.err (!%p3529_p13)
}
  0x36   : > { %s4605_s22 = smov 64   ;;  %s4607_s23 = smov 4  }
  0x37   : > { %3289 = dma.hbm_to_vmem [thread:$0]  (!%p3966_p4), %s472_s19, 3072, %s474_s8, %s3976_s7, %s4605_s22, %s4605_s22, %s4607_s23  }
  0x38   : > { %p593_p1 = scmp.lt.s32.totalorder %s3805_s18, 5  ;;  %s2922_s6 = sshll.u32 %s3960_s21, 7 }
  0x39   : > { %s3062_s13 = sshll.u32 %s3797_s16, 11  ;;  %s4657_s9 = sld [smem:[#allocation46_spill]] }
  0x3a   : > { %p3997_p3 = pnand %p2929_p5, %p593_p1  ;;  %s533_s2 = scalar_lea.vmem [#allocation9], %s2922_s6 }
  0x3b   : > { %s540_s1 = sshll.u32 %s533_s2, 4  ;;  %s4658_s14 = sand.u32 1, %s3805_s18   ;;  %s541_s1 = int_to_ptr.vmem [resolvable:$true] %s540_s1 }
  0x3c   : > { %s4006_s12 = scalar_lea.sflag [#allocation10], %s4658_s14  ;;  %s3546_s5 = scalar_lea.vmem %s541_s1, 2048 }
  0x3d   : > { %p3547_p7 = scmp.ne.s32.totalorder %s541_s1, %s3546_s5  ;;  %s3810_s8 = smov [#allocation9]  }
  0x3e   : > { %s3551_s19 = sshll.u32 %s3810_s8, 4  ;;  %s3552_s19 = int_to_ptr.vmem [resolvable:$false] %s3551_s19 }
  0x3f   : > { %s539_s3 = scalar_lea.hbm %s4657_s9, %s3062_s13  ;;  %p3549_p8 = pnand %p3547_p7, %p3980_p6 }
  0x40   : > { %s3553_s22 = scalar_lea.vmem %s3552_s19, 4096  ;;  %p3554_p5 = scmp.lt.s32.totalorder %s541_s1, %s3552_s19 }
  0x41   : > { %p3550_p9 = pneg %p3549_p8  ;;  %p3555_p10 = scmp.lt.s32.totalorder %s3553_s22, %s3546_s5 }
  0x43   : > { %p3556_p11 = por %p3555_p10, %p3554_p5 }
  0x45   : > { %p3557_p12 = pnand %p3556_p11, %p3550_p9 }
  0x47   : > { %3560 = shalt.err (!%p3557_p12)
}
  0x48   : > { %s3811_s20 = smov 128   ;;  %s3812_s2 = smov 8  }
  0x49   : > { %3295 = dma.hbm_to_vmem [thread:$0]  (!%p3966_p4), %s539_s3, 2048, %s541_s1, %s4006_s12, %s3811_s20, %s3811_s20, %s3812_s2  }
  0x4a   : > { %s4659_s11 = sld [smem:[#allocation48_spill]]  ;;  %s561_s10 = scalar_lea.vmem [#allocation11], %s2922_s6 }
  0x4b   : > { %s568_s8 = sshll.u32 %s561_s10, 4  ;;  %s4021_s19 = sadd.s32 4294967295, %s3805_s18   ;;  %s4018_s8 = int_to_ptr.vmem [resolvable:$true] %s568_s8 }
  0x4c   : > { %s2913_s23 = sadd.s32 4294967294, %s3805_s18   ;;  %s47_s9 = sadd.s32 1, %s3797_s16 }
  0x4d   : > { %p48_p13 = scmp.ge.s32.totalorder %s47_s9, 2  ;;  %s50_s1 = sadd.s32 1, %s3801_s17 }
  0x4e   : > { %s57_s3 = sadd.s32 1, %s3785_s30  ;;  %p64_p1 = scmp.ne.s32.totalorder %s3785_s30, %s3781_s29 }
  0x4f   : > { %s4720_s9 = smov (%p48_p13, %s47_s9), 0  ;;  %s4722_s1 = smov (!%p48_p13, %s50_s1), %s3801_s17 }
  0x50   : > { %s4016_s22 = scalar_lea.hbm %s4659_s11, %s3062_s13  ;;  %4660 = sst [smem:[#allocation30_spill]] %s4720_s9 }
  0x51   : > { %p4037_p7 = por %p65_p0, %p64_p1  ;;  %p4610_p8 = scmp.ne.s32.totalorder %s3781_s29, %s3777_s28 }
  0x52   : > { %p52_p9 = scmp.ge.s32.totalorder %s4722_s1, 2  ;;  %p71_p5 = scmp.eq.s32.totalorder %s4021_s19, 0 }
  0x53   : > { %s132_s13 = ssub.s32 %s3797_s16, %s4720_s9  ;;  %p148_p10 = scmp.ne.s32.totalorder %s3769_s26, %s3765_s25 }
  0x54   : > { %s4724_s1 = smov (%p52_p9, %s4722_s1), 0  ;;  %p4053_p11 = por %p71_p5, %p4610_p8 }
  0x55   : > { %4662 = sst [smem:[#allocation31_spill]] %s4724_s1  ;;  %p133_p0 = scmp.eq.s32.totalorder %s132_s13, 0 }
  0x56   : > { %s4663_s20 = scalar_select %p4053_p11, 1, 0 }
  0x57   : > { %s54_s2 = ssub.s32 %s3801_s17, %s4724_s1  ;;  %p4059_p12 = por %p148_p10, %p71_p5 }
  0x58   : > { %p55_p13 = scmp.eq.s32.totalorder %s54_s2, 0  ;;  %p406_p2 = scmp.eq.s32.totalorder %s4021_s19, 3 }
  0x59   : > { %s4664_s5 = scalar_select %p4059_p12, 1, 0 }
  0x5a   : > { %s4666_s25 = sadd.s32 1, %s3773_s27  ;;  %p4075_p9 = por %p406_p2, %p64_p1 }
  0x5b   : > { %4665 = sst [smem:[#allocation32_spill]] %s4664_s5  ;;  %p412_p8 = scmp.eq.s32.totalorder %s2913_s23, 3 }
  0x5c   : > { %s4067_s14 = scalar_select %p133_p0, %s3773_s27, %s4666_s25  }
  0x5d   : > { %s4070_s10 = scalar_select %p55_p13, %s3785_s30, %s57_s3  }
  0x5e   : > { %4667 = sst [smem:[#allocation33_spill]] %s4067_s14  ;;  %s432_s13 = sand.u32 1, %s3785_s30  }
  0x5f   : > { %4668 = sst [smem:[#allocation34_spill]] %s4070_s10  ;;  %s2917_s1 = sshll.u32 %s3801_s17, 7 }
  0x60   : > { %s4669_s11 = scalar_select %p4075_p9, 1, 0 }
  0x61   : > { %p4671_p11 = scmp.ne.s32.totalorder %s3781_s29, %s3777_s28  ;;  %s2916_s2 = sshll.u32 %s432_s13, 3 }
  0x62   : > { %4670 = sst [smem:[#allocation35_spill]] %s4669_s11  ;;  %p4675_p10 = scmp.lt.s32.totalorder %s3805_s18, 4 }
  0x63   : > { %p4084_p5 = por %p412_p8, %p4671_p11  ;;  %s4674_s0 = sld [smem:[#allocation37_spill]] }
  0x64   : > { %p4095_p0 = pnand %p4675_p10, %p4037_p7  ;;  %s436_s23 = scalar_lea.vmem [#allocation3], %s2916_s2 }
  0x65   : > { %s4672_s9 = scalar_select %p4084_p5, 1, 0 }
  0x66   : > { %s443_s10 = sshll.u32 %s436_s23, 4  ;;  %s2919_s17 = sshll.u32 %s3960_s21, 6  ;;  %s444_s10 = int_to_ptr.vmem [resolvable:$true] %s443_s10 }
  0x67   : > { %4673 = sst [smem:[#allocation36_spill]] %s4672_s9  ;;  %s433_s30 = scalar_lea.sflag [#allocation4], %s432_s13 }
  0x68   : > { %p3563_p2 = pneg %p4095_p0  ;;  %s3574_s14 = scalar_lea.vmem %s444_s10, 128 }
  0x69   : > { %s441_s25 = scalar_lea.hbm %s4674_s0, %s2917_s1  ;;  %p3575_p1 = scmp.ne.s32.totalorder %s444_s10, %s3574_s14 }
  0x6a   : > { %s3813_s26 = smov [#allocation3]  }
  0x6b   : > { %p3577_p8 = pnand %p3575_p1, %p3563_p2  ;;  %s3579_s1 = sshll.u32 %s3813_s26, 4  ;;  %s3580_s1 = int_to_ptr.vmem [resolvable:$false] %s3579_s1 }
  0x6c   : > { %s3581_s6 = scalar_lea.vmem %s3580_s1, 256  ;;  %p3582_p7 = scmp.lt.s32.totalorder %s444_s10, %s3580_s1 }
  0x6d   : > { %p3578_p11 = pneg %p3577_p8  ;;  %p3583_p13 = scmp.lt.s32.totalorder %s3581_s6, %s3574_s14 }
  0x6f   : > { %p3584_p10 = por %p3583_p13, %p3582_p7 }
  0x71   : > { %p3585_p5 = pnand %p3584_p10, %p3578_p11 }
  0x73   : > { %3588 = shalt.err (!%p3585_p5)
}
  0x74   : > { %3286 = dma.hbm_to_vmem [thread:$0]  (!%p4095_p0), %s441_s25, 128, %s444_s10, %s433_s30  }
  0x75   : > { %s3061_s5 = sshll.u32 %s3797_s16, 10  ;;  %s4677_s23 = sld [smem:[#allocation42_spill]] }
  0x76   : > { %s494_s27 = scalar_lea.vmem [#allocation8], %s2919_s17  ;;  %s3814_s14 = smov [#allocation8]  }
  0x77   : > { %s501_s9 = sshll.u32 %s494_s27, 4  ;;  %s3607_s1 = sshll.u32 %s3814_s14, 4  ;;  %s502_s9 = int_to_ptr.vmem [resolvable:$true] %s501_s9  ;;  %s3608_s1 = int_to_ptr.vmem [resolvable:$false] %s3607_s1 }
  0x78   : > { %s3602_s26 = scalar_lea.vmem %s502_s9, 1024  ;;  %s3609_s3 = scalar_lea.vmem %s3608_s1, 2048 }
  0x79   : > { %p3603_p2 = scmp.ne.s32.totalorder %s502_s9, %s3602_s26  ;;  %p3610_p5 = scmp.lt.s32.totalorder %s502_s9, %s3608_s1 }
  0x7a   : > { %p3611_p11 = scmp.lt.s32.totalorder %s3609_s3, %s3602_s26 }
  0x7b   : > { %s500_s0 = scalar_lea.hbm %s4677_s23, %s3061_s5  ;;  %p3605_p1 = pnand %p3603_p2, %p3980_p6 }
  0x7c   : > { %p3612_p0 = por %p3611_p11, %p3610_p5 }
  0x7d   : > { %p3606_p8 = pneg %p3605_p1 }
  0x7f   : > { %p3613_p7 = pnand %p3612_p0, %p3606_p8 }
  0x81   : > { %3616 = shalt.err (!%p3613_p7)
}
  0x82   : > { %s4678_s30 = smov 4   ;;  %s4679_s17 = smov 64  }
  0x83   : > { %3292 = dma.hbm_to_vmem [thread:$0]  (!%p3966_p4), %s500_s0, 1024, %s502_s9, %s3976_s7, %s4679_s17, %s4679_s17, %s4678_s30  }
  0x84   : > { %s3630_s27 = scalar_lea.vmem %s4018_s8, 2048  ;;  %s3815_s10 = smov [#allocation11]  }
  0x85   : > { %p3631_p13 = scmp.ne.s32.totalorder %s4018_s8, %s3630_s27  ;;  %s3635_s25 = sshll.u32 %s3815_s10, 4  ;;  %s3636_s25 = int_to_ptr.vmem [resolvable:$false] %s3635_s25 }
  0x86   : > { %s3637_s6 = scalar_lea.vmem %s3636_s25, 4096  ;;  %p3638_p1 = scmp.lt.s32.totalorder %s4018_s8, %s3636_s25 }
  0x87   : > { %p3633_p10 = pnand %p3631_p13, %p3980_p6  ;;  %p3639_p8 = scmp.lt.s32.totalorder %s3637_s6, %s3630_s27 }
  0x89   : > { %p3634_p2 = pneg %p3633_p10  ;;  %p3640_p5 = por %p3639_p8, %p3638_p1 }
  0x8b   : > { %p3641_p11 = pnand %p3640_p5, %p3634_p2 }
  0x8d   : > { %3644 = shalt.err (!%p3641_p11)
}
  0x8e   : > { %3298 = dma.hbm_to_vmem [thread:$0]  (!%p3966_p4), %s4016_s22, 2048, %s4018_s8, %s4006_s12, %s4679_s17, %s4679_s17, %s4678_s30  }
  0x8f   : > { %s2928_s0 = sshll.u32 %s3797_s16, 4  ;;  %s4680_s5 = sld [smem:[#allocation49_spill]] }
  0x90   : > { %s581_s2 = scalar_lea.vmem [#allocation12], %s3960_s21  ;;  %s579_s26 = scalar_lea.sflag [#allocation13], %s3960_s21 }
  0x91   : > { %s588_s23 = sshll.u32 %s581_s2, 4  ;;  %s3816_s1 = smov [#allocation12]   ;;  %s589_s23 = int_to_ptr.vmem [resolvable:$true] %s588_s23 }
  0x92   : > { %s3658_s14 = scalar_lea.vmem %s589_s23, 16  ;;  %s3663_s3 = sshll.u32 %s3816_s1, 4  ;;  %s3664_s3 = int_to_ptr.vmem [resolvable:$false] %s3663_s3 }
  0x93   : > { %p3659_p0 = scmp.ne.s32.totalorder %s589_s23, %s3658_s14  ;;  %s3665_s27 = scalar_lea.vmem %s3664_s3, 32 }
  0x94   : > { %p3666_p10 = scmp.lt.s32.totalorder %s589_s23, %s3664_s3  ;;  %p3667_p2 = scmp.lt.s32.totalorder %s3665_s27, %s3658_s14 }
  0x95   : > { %s586_s13 = scalar_lea.hbm %s4680_s5, %s2928_s0  ;;  %p3661_p7 = pnand %p3659_p0, %p3980_p6 }
  0x96   : > { %p3668_p1 = por %p3667_p2, %p3666_p10 }
  0x97   : > { %p3662_p13 = pneg %p3661_p7 }
  0x99   : > { %p3669_p8 = pnand %p3668_p1, %p3662_p13 }
  0x9b   : > { %3672 = shalt.err (!%p3669_p8)
}
  0x9c   : > { %3301 = dma.hbm_to_vmem [thread:$0]  (!%p3966_p4), %s586_s13, 16, %s589_s23, %s579_s26  }
  0x9d   : > { %597 = sbr.rel (%p3997_p3) target bundleno = 2720 (0xaa0), region = 72  ;;  %s4142_s4 = sand.u32 (!%p3997_p3), 1, %s3781_s29  }
  0x9e   : > { %s4621_s12 = sshll.u32 (!%p3997_p3), %s4142_s4, 3  ;;  %s600_s21 = scalar_lea.sflag (!%p3997_p3), [#allocation4], %s4142_s4 }
  0x9f   : > { %s4148_s22 = scalar_lea.vmem (!%p3997_p3), [#allocation3], %s4621_s12  ;;  %p4681_p6 = scmp.ne.s32.totalorder (!%p3997_p3), %s4663_s20, 0 }
  0xa2   : > { %3744 = dma.done.wait (%p4681_p6), %s600_s21, 128  }
  0xa3   : > { %3746 = vsyncadd (%p4681_p6), %s600_s21, 4294967168  ;;  %s4682_s24 = sld [smem:[#allocation20_spill]]  ;;  %s608_s8 = sand.u32 1, %s4021_s19  }
  0xa4   : > { %s609_s10 = scalar_lea.sflag [#allocation7], %s608_s8 }
  0xa9   : > { %s4156_s30 = sand.u32 1, %s4682_s24  }
  0xaa   : > { %s3268_s17 = smul.u32 192, %s4156_s30 }
  0xac   : > { %s4159_s25 = scalar_lea.vmem [#allocation6], %s3268_s17 }
  0xad   : > { %3748 = dma.done.wait (%p4059_p12), %s609_s10, 4096  }
  0xae   : > { %3750 = vsyncadd (%p4059_p12), %s609_s10, 4294963200  ;;  %s2931_s20 = sshll.u32 %s4156_s30, 6  ;;  %s2932_s6 = sshll.u32 %s4156_s30, 7 }
  0xaf   : > { %s4167_s0 = scalar_lea.vmem [#allocation8], %s2931_s20  ;;  %s627_s19 = scalar_lea.sflag [#allocation10], %s608_s8 }
  0xb0   : > { %s4169_s7 = scalar_lea.vmem [#allocation9], %s2932_s6 }
  0xb1   : > { %3752 = dma.done.wait (%p4059_p12), %s627_s19, 4096  }
  0xb2   : > { %3754 = vsyncadd (%p4059_p12), %s627_s19, 4294963200  ;;  %s4175_s9 = scalar_lea.vmem [#allocation11], %s2932_s6  ;;  %s645_s5 = scalar_lea.sflag [#allocation13], %s4156_s30 }
  0xb3   : > { %3756 = dma.done.wait (%p4059_p12), %s645_s5, 16  }
  0xb4   : > { %3758 = vsyncadd (%p4059_p12), %s645_s5, 4294967280  ;;  %s4684_s2 = sld [smem:[#allocation25_spill]]  ;;  %s4692_s17 = sshll.u32 %s4142_s4, 3 }
  0xb5   : > { %s4687_s20 = sld [smem:[#allocation43_spill]]  ;;  %s4221_s10 = scalar_lea.vmem [#allocation14], %s4692_s17 }
  0xb6   : > { %s4688_s13 = sld [smem:[#allocation41_spill]] }
  0xb7   : > { %s4689_s16 = sld [smem:[#allocation44_spill]] }
  0xb8   : > { %s4690_s3 = sld [smem:[#allocation45_spill]] }
  0xb9   : > { %s4691_s15 = sld [smem:[#allocation47_spill]] }
  0xba   : > { %p737_p4 = scmp.lt.s32.totalorder %s4684_s2, 1  ;;  %p2937_p3 = scmp.ne.s32.totalorder %s4684_s2, 0 }
  0xbc   : > { %s4185_s23 = scalar_select %p737_p4, %s4684_s2, 1 }
  0xbd   : > { %764 = sbr.rel (%p2937_p3) target bundleno = 196 (0xc4), region = 100 }
  0xbe   : > { %s2935_s8 = sshll.u32 %s4185_s23, 2  ;;  %s749_s6 = scalar_lea.vmem %s4687_s20, %s4185_s23 }
  0xbf   : > { %s4203_s26 = scalar_lea.vmem %s4688_s13, %s2935_s8  ;;  %s752_s29 = scalar_lea.vmem %s4689_s16, %s4185_s23 }
  0xc0   : > { %s755_s18 = scalar_lea.vmem %s4690_s3, %s4185_s23  ;;  %s2936_s27 = sshll.u32 %s4185_s23, 1 }
  0xc1   : > { %s4217_s11 = scalar_lea.vmem %s4691_s15, %s2936_s27 }
  0xc2   : > { %v765_v0 = vld [vmem:[%s4148_s22] sm:$0xff] }
  0xc3   : > { %766 = vst [vmem:[#allocation2] sm:$0xff] %v765_v0 }
  0xc4 PF: > { %v3408_v2 = vld [vmem:[%s4159_s25 + $0x38] sm:$0xff]   ;;  %v3410_v4 = vld [vmem:[%s4159_s25 + $0x30] sm:$0xff]   ;;  %v3817_v5 = vmov 0.0   ;;  %v3412_v11 = vld [vmem:[%s4159_s25 + $0x28] sm:$0xff]   ;;  %vm3818_vm0 = vmmov 0   ;;  %s4693_s12 = sld [smem:[#allocation38_spill]]  ;;  %v814_v41 = vlaneseq }
  0xc5   : > { %v3409_v3 = vld [vmem:[%s4159_s25 + $0x78] sm:$0xff]   ;;  %3138 = vmatprep.subr.bf16.mxu0 %v3817_v5  ;;  %3158 = vmatprep.subr.bf16.mxu1 %v3817_v5  ;;  %v3411_v6 = vld [vmem:[%s4159_s25 + $0x70] sm:$0xff]   ;;  %v3413_v12 = vld [vmem:[%s4159_s25 + $0x68] sm:$0xff]   ;;  %s4695_s3 = sld [smem:[#allocation39_spill]]  ;;  %s3820_s8 = smov 96   ;;  %vm1574_vm1 = vcmask 261120  }
  0xc6   : > { %3139 = vmatpush3.bf16.msra.mxu0 %v3408_v2  ;;  %3159 = vmatpush3.bf16.msra.mxu1 %v3409_v3  ;;  %v3414_v13 = vld [vmem:[%s4159_s25 + $0x20] sm:$0xff]   ;;  %v3416_v15 = vld [vmem:[%s4159_s25 + $0x18] sm:$0xff]   ;;  %v3418_v17 = vld [vmem:[%s4159_s25 + $0x10] sm:$0xff]   ;;  %v4295_v42 = vshrl.u32 %v814_v41, 7  ;;  %s3821_s20 = smov 64   ;;  %vm1763_vm2 = vcmask 64512  }
  0xc7   : > { %3140 = vmatprep.subr.bf16.mxu0 %v3817_v5  ;;  %3160 = vmatprep.subr.bf16.mxu1 %v3817_v5  ;;  %v3415_v14 = vld [vmem:[%s4159_s25 + $0x60] sm:$0xff]   ;;  %v3417_v16 = vld [vmem:[%s4159_s25 + $0x58] sm:$0xff]   ;;  %v3419_v18 = vld [vmem:[%s4159_s25 + $0x50] sm:$0xff]   ;;  %v3822_v62 = vmov 1983009808   ;;  %vm1815_vm3 = vcmask 1043456  }
  0xc8   : > { %3154 = vmatprep.mubr.msk.bf16.mxu0 %vm3818_vm0, %v3817_v5  ;;  %3174 = vmatprep.mubr.msk.bf16.mxu1 %vm3818_vm0, %v3817_v5  ;;  %v3420_v19 = vld [vmem:[%s4159_s25 + $0x8] sm:$0xff]   ;;  %v3422_v21 = vld [vmem:[%s4159_s25] sm:$0xff]   ;;  %v3424_v32 = vld [vmem:[%s4159_s25 + $0xb8] sm:$0xff]   ;;  %v925_v43 = vsub.s32 1, %v4295_v42  ;;  %v816_v48 = vsub.s32 0, %v4295_v42  ;;  %v1137_v63 = vunpack.c.l.s4 %v3822_v62  ;;  %vm2146_vm4 = vcmask 523264  }
  0xc9   : > { %v3421_v20 = vld [vmem:[%s4159_s25 + $0x48] sm:$0xff]   ;;  %v3423_v22 = vld [vmem:[%s4159_s25 + $0x40] sm:$0xff]   ;;  %v3425_v34 = vld [vmem:[%s4159_s25 + $0xb0] sm:$0xff]   ;;  %v3823_v0 = vmov 1934713408   ;;  %vm2148_vm5 = vcmask 785408  }
  0xca   : > { %v767_v1 = vld [vmem:[#allocation2] sm:$0xff]  ;;  %3141 = vmatpush3.bf16.msra.mxu0 %v3410_v4  ;;  %3161 = vmatpush3.bf16.msra.mxu1 %v3411_v6  ;;  %s4694_s22 = scalar_lea.vmem %s4693_s12, %s4185_s23  ;;  %v3427_v36 = vld [vmem:[%s4159_s25 + $0xa0] sm:$0xff]   ;;  %v3428_v37 = vld [vmem:[%s4159_s25 + $0x98] sm:$0xff]   ;;  %v1138_v2 = vunpack.c.0.s8 %v1137_v63 }
  0xcb   : > { %770 = vadd.xlane.f32.xlu0 %v767_v1  ;;  %3142 = vmatprep.subr.bf16.mxu0 %v3817_v5  ;;  %v2938_v27 = vld [vmem:[%s4694_s22] ss:$0 sm:$0xff]  ;;  %s4696_s15 = scalar_lea.vmem %s4695_s3, %s4185_s23  ;;  %v3429_v38 = vld [vmem:[%s4159_s25 + $0x90] sm:$0xff]   ;;  %v3431_v40 = vld [vmem:[%s4159_s25 + $0x80] sm:$0xff]  }
  0xcc   : > { %3162 = vmatprep.subr.bf16.mxu1 %v3817_v5  ;;  %v2939_v29 = vld [vmem:[%s4696_s15] ss:$0 sm:$0xff] }
  0xcd   : > { %v3426_v35 = vld [vmem:[%s4159_s25 + $0xa8] sm:$0xff]  }
  0xce   : > { %3143 = vmatpush3.bf16.msra.mxu0 %v3412_v11  ;;  %3163 = vmatpush3.bf16.msra.mxu1 %v3413_v12  ;;  %v3430_v39 = vld [vmem:[%s4159_s25 + $0x88] sm:$0xff]   ;;  %s3819_s25 = smov 32  }
  0xcf   : > { %3144 = vmatprep.subr.bf16.mxu0 %v3817_v5  ;;  %3164 = vmatprep.subr.bf16.mxu1 %v3817_v5  ;;  %v4299_v44 = vld [vmem:[%s4203_s26] sm:$0x7] }
  0xd0   : > { %v926_v45 = vrot.slane %v4299_v44, %v925_v43  ;;  %v817_v54 = vrot.slane %v4299_v44, %v816_v48 }
  0xd2   : > { %3145 = vmatpush3.bf16.msra.mxu0 %v3414_v13  ;;  %3165 = vmatpush3.bf16.msra.mxu1 %v3415_v14 }
  0xd3   : > { %3146 = vmatprep.subr.bf16.mxu0 %v3817_v5  ;;  %3166 = vmatprep.subr.bf16.mxu1 %v3817_v5 }
  0xd6   : > { %3147 = vmatpush3.bf16.msra.mxu0 %v3416_v15  ;;  %3167 = vmatpush3.bf16.msra.mxu1 %v3417_v16 }
  0xd7   : > { %3148 = vmatprep.subr.bf16.mxu0 %v3817_v5  ;;  %3168 = vmatprep.subr.bf16.mxu1 %v3817_v5 }
  0xda   : > { %3149 = vmatpush3.bf16.msra.mxu0 %v3418_v17  ;;  %3169 = vmatpush3.bf16.msra.mxu1 %v3419_v18 }
  0xdb   : > { %3150 = vmatprep.subr.bf16.mxu0 %v3817_v5  ;;  %3170 = vmatprep.subr.bf16.mxu1 %v3817_v5 }
  0xde   : > { %3151 = vmatpush3.bf16.msra.mxu0 %v3420_v19  ;;  %3171 = vmatpush3.bf16.msra.mxu1 %v3421_v20 }
  0xdf   : > { %3152 = vmatprep.subr.bf16.mxu0 %v3817_v5  ;;  %3172 = vmatprep.subr.bf16.mxu1 %v3817_v5 }
  0xe2   : > { %3153 = vmatpush3.bf16.msra.mxu0 %v3422_v21  ;;  %3173 = vmatpush3.bf16.msra.mxu1 %v3423_v22 }
  0xe3   : > { %3178 = vmatprep.subr.bf16.mxu0 %v3817_v5  ;;  %3198 = vmatprep.subr.bf16.mxu1 %v3817_v5 }
 0x154   : > { %v771_v7 = vpop.xlane.xlu0 %770 }
 0x155   : > { %v773_v8 = vmul.f32 0.0078125, %v771_v7  ;;  %v4317_v7 = vsub.s32 %v1138_v2, %v4295_v42 }
 0x157   : > { %v774_v9 = vsub.f32 %v767_v1, %v773_v8  ;;  %v1169_v1 = vunpack.c.l.s4 %v3823_v0 }
 0x159   : > { %v775_v10 = vmul.f32 %v774_v9, %v774_v9  ;;  %v1170_v6 = vunpack.c.0.s8 %v1169_v1 }
 0x15b   : > { %776 = vadd.xlane.f32.xlu0 %v775_v10  ;;  %v4320_v13 = vsub.s32 %v1170_v6, %v4295_v42 }
 0x1e4   : > { %v777_v23 = vpop.xlane.xlu0 %776 }
 0x1e5   : > { %v778_v24 = vmul.f32 0.0078125, %v777_v23 }
 0x1e7   : > { %v779_v25 = vadd.f32 1e-05, %v778_v24 }
 0x1e9   : > { %3480 = vrsqrt.f32 %v779_v25 }
 0x1f6   : > { %v3481_v26 = vpop.eup %3480 }
 0x1f7   : > { %v781_v28 = vmul.f32 %v3481_v26, %v774_v9 }
 0x1f9   : > { %v788_v30 = vmul.f32 %v2938_v27, %v781_v28 }
 0x1fb   : > { %v795_v31 = vadd.f32 %v2939_v29, %v788_v30 }
 0x1fd   : > { %v796_v33 = vpack.c.bf16 %v795_v31, %v795_v31 }
 0x1ff   : > { %3155 = vmatmul.mubr.bf16.vlgmr.msra.gmra.mxu0 %v796_v33  ;;  %3175 = vmatmul.mubr.bf16.vlgmr.msra.gmra.mxu1 %v796_v33 }
 0x200   : > { %3179 = vmatpush3.bf16.msra.mxu0 %v3424_v32  ;;  %3194 = vmatprep.mubr.msk.bf16.mxu0 %vm3818_vm0, %v3817_v5 }
 0x201   : > { %3180 = vmatprep.subr.bf16.mxu0 %v3817_v5  ;;  %3200 = vmatprep.mubr.msk.bf16.mxu1 %vm3818_vm0, %v3817_v5 }
 0x204   : > { %3181 = vmatpush3.bf16.msra.mxu0 %v3425_v34 }
 0x205   : > { %3182 = vmatprep.subr.bf16.mxu0 %v3817_v5 }
 0x208   : > { %3183 = vmatpush3.bf16.msra.mxu0 %v3426_v35 }
 0x209   : > { %3184 = vmatprep.subr.bf16.mxu0 %v3817_v5 }
 0x20c   : > { %3185 = vmatpush3.bf16.msra.mxu0 %v3427_v36 }
 0x20d   : > { %3186 = vmatprep.subr.bf16.mxu0 %v3817_v5 }
 0x210   : > { %3187 = vmatpush3.bf16.msra.mxu0 %v3428_v37 }
 0x211   : > { %3188 = vmatprep.subr.bf16.mxu0 %v3817_v5 }
 0x214   : > { %3189 = vmatpush3.bf16.msra.mxu0 %v3429_v38 }
 0x215   : > { %3190 = vmatprep.subr.bf16.mxu0 %v3817_v5 }
 0x218   : > { %3191 = vmatpush3.bf16.msra.mxu0 %v3430_v39 }
 0x219   : > { %3192 = vmatprep.subr.bf16.mxu0 %v3817_v5 }
 0x21c   : > { %3193 = vmatpush3.bf16.msra.mxu0 %v3431_v40 }
 0x21d   : > { %3246 = vmatprep.subr.bf16.mxu0 %v3817_v5 }
 0x21f   : > { %3195 = vmatmul.mubr.bf16.vlgmr.msra.gmra.mxu0 %v796_v33 }
 0x220   : > { %3262 = vmatprep.mubr.msk.bf16.mxu0 %vm3818_vm0, %v3817_v5 }
 0x2bf   : > { %v900_v46 = vpop.f32.mrf.mxu0  ;;  %v1009_v47 = vpop.f32.mrf.mxu1 }
 0x2c0   : > { %v1010_v49 = vadd.f32 %v1009_v47, %v926_v45  ;;  %v901_v57 = vadd.f32 %v900_v46, %v817_v54 }
 0x2c1   : > { %v3156_v50 = vpop.f32.mrf.mxu0  ;;  %v3176_v51 = vpop.f32.mrf.mxu1 }
 0x2c2   : > { %1281 = vrot.lane.b32.xlu0 %v1010_v49, %s3819_s25  ;;  %1275 = vrot.lane.b32.xlu1 %v1010_v49, %s3820_s8 }
 0x2c3   : > { %v903_v52 = vpop.f32.mrf.mxu0  ;;  %v1012_v53 = vpop.f32.mrf.mxu1 }
 0x2c5   : > { %v3157_v55 = vpop.f32.mrf.mxu0  ;;  %v3177_v56 = vpop.f32.mrf.mxu1 }
 0x2c6   : > { %1278 = vrot.lane.b32.xlu1 %v1010_v49, %s3821_s20 }
 0x2ca   : > { %1125 = vrot.lane.b32.xlu1 %v901_v57, %s3820_s8 }
 0x2ce   : > { %1128 = vrot.lane.b32.xlu1 %v901_v57, %s3821_s20 }
 0x2d2   : > { %1131 = vrot.lane.b32.xlu1 %v901_v57, %s3819_s25 }
 0x2df   : > { %v4314_v58 = vpop.f32.mrf.mxu0 }
 0x2e1   : > { %v3196_v59 = vpop.f32.mrf.mxu0 }
 0x2e3   : > { %v1121_v60 = vpop.f32.mrf.mxu0 }
 0x2e5   : > { %v3197_v61 = vpop.f32.mrf.mxu0 }
 0x334   : > { %v1282_v3 = vpop.permute.xlu0 %1281  ;;  %v1276_v4 = vpop.permute.xlu1 %1275 }
 0x335   : > { %v1300_v8 = vcombine.low %v1276_v4, %v1282_v3  ;;  %v1301_v9 = vcombine.high %v1276_v4, %v1282_v3 }
 0x337   : > { %v1308_v14 = vrot.slane %v1300_v8, %v4317_v7  ;;  %v1315_v15 = vrot.slane %v1301_v9, %v4317_v7 }
 0x338   : > { %v1279_v10 = vpop.permute.xlu1 %1278 }
 0x339   : > { %v1284_v11 = vcombine.low %v1010_v49, %v1279_v10  ;;  %v1285_v12 = vcombine.high %v1010_v49, %v1279_v10 }
 0x33b   : > { %v1292_v16 = vrot.slane %v1284_v11, %v4317_v7  ;;  %v1299_v17 = vrot.slane %v1285_v12, %v4317_v7 }
 0x33c   : > { %v1126_v18 = vpop.permute.xlu1 %1125 }
 0x33d   : > { %v1316_v19 = vcombine.low %v1292_v16, %v1308_v14  ;;  %v1317_v20 = vcombine.high %v1292_v16, %v1308_v14  ;;  %v1332_v21 = vcombine.low %v1299_v17, %v1315_v15  ;;  %v1333_v22 = vcombine.high %v1299_v17, %v1315_v15 }
 0x33f   : > { %v1324_v23 = vrot.slane %v1316_v19, %v4320_v13  ;;  %v1331_v24 = vrot.slane %v1317_v20, %v4320_v13  ;;  %v1340_v25 = vrot.slane %v1332_v21, %v4320_v13  ;;  %v1347_v26 = vrot.slane %v1333_v22, %v4320_v13 }
 0x340   : > { %v1129_v27 = vpop.permute.xlu1 %1128 }
 0x341   : > { %v1352_v28 = vcombine.low %v1324_v23, %v1331_v24  ;;  %v2998_v29 = vcombine.high %v1324_v23, %v1331_v24  ;;  %v1368_v30 = vcombine.low %v1340_v25, %v1347_v26  ;;  %v2999_v31 = vcombine.high %v1340_v25, %v1347_v26 }
 0x342   : > { %v1134_v32 = vcombine.low %v901_v57, %v1129_v27  ;;  %v1135_v33 = vcombine.high %v901_v57, %v1129_v27 }
 0x343   : > { %v1359_v34 = vrot.slane %v1352_v28, %v4317_v7  ;;  %v1367_v35 = vrot.slane %v2998_v29, %v4317_v7  ;;  %v1375_v36 = vrot.slane %v1368_v30, %v4317_v7  ;;  %v1383_v37 = vrot.slane %v2999_v31, %v4317_v7 }
 0x344   : > { %v1132_v38 = vpop.permute.xlu1 %1131  ;;  %v1142_v46 = vrot.slane %v1134_v32, %v4317_v7  ;;  %v1149_v47 = vrot.slane %v1135_v33, %v4317_v7 }
 0x345   : > { %v1150_v39 = vcombine.low %v1126_v18, %v1132_v38  ;;  %v1151_v40 = vcombine.high %v1126_v18, %v1132_v38  ;;  %v1384_v41 = vcombine.low %v1359_v34, %v1367_v35  ;;  %v1400_v45 = vcombine.low %v1375_v36, %v1383_v37 }
 0x346   : > { %v1385_v11 = vcombine.high %v1359_v34, %v1367_v35  ;;  %v1401_v16 = vcombine.high %v1375_v36, %v1383_v37 }
 0x347   : > { %v1158_v49 = vrot.slane %v1150_v39, %v4317_v7  ;;  %v1165_v50 = vrot.slane %v1151_v40, %v4317_v7  ;;  %v1392_v51 = vrot.slane %v1384_v41, %v4320_v13  ;;  %v1408_v52 = vrot.slane %v1400_v45, %v4320_v13 }
 0x348   : > { %v1399_v21 = vrot.slane %v1385_v11, %v4320_v13  ;;  %v1415_v22 = vrot.slane %v1401_v16, %v4320_v13 }
 0x349   : > { %v1166_v53 = vcombine.low %v1142_v46, %v1158_v49  ;;  %v1167_v54 = vcombine.high %v1142_v46, %v1158_v49  ;;  %v1182_v55 = vcombine.low %v1149_v47, %v1165_v50  ;;  %v1183_v56 = vcombine.high %v1149_v47, %v1165_v50 }
 0x34a   : > { %v1416_v57 = vcombine.low %v1392_v51, %v1408_v52  ;;  %v1417_v15 = vcombine.high %v1392_v51, %v1408_v52  ;;  %v1418_v25 = vcombine.low %v1399_v21, %v1415_v22  ;;  %v1419_v34 = vcombine.high %v1399_v21, %v1415_v22 }
 0x34b   : > { %v1174_v59 = vrot.slane %v1166_v53, %v4320_v13  ;;  %v1181_v60 = vrot.slane %v1167_v54, %v4320_v13  ;;  %v1190_v61 = vrot.slane %v1182_v55, %v4320_v13  ;;  %v1197_v62 = vrot.slane %v1183_v56, %v4320_v13 }
 0x34c   : > { %v1420_v63 = vpack.c.bf16 %v1416_v57, %v1416_v57  ;;  %v1421_v20 = vpack.c.bf16 %v1417_v15, %v1417_v15  ;;  %v1422_v29 = vpack.c.bf16 %v1418_v25, %v1418_v25  ;;  %v1423_v36 = vpack.c.bf16 %v1419_v34, %v1419_v34 }
 0x34d   : > { %v1202_v0 = vcombine.low %v1174_v59, %v1181_v60  ;;  %v2996_v1 = vcombine.high %v1174_v59, %v1181_v60  ;;  %v1218_v2 = vcombine.low %v1190_v61, %v1197_v62  ;;  %v2997_v3 = vcombine.high %v1190_v61, %v1197_v62 }
 0x34e   : > { %v1579_v4 = vsel %vm1574_vm1, %v1420_v63, 0  ;;  %v1625_v24 = vsel %vm1574_vm1, %v1421_v20, 0  ;;  %v1671_v33 = vsel %vm1574_vm1, %v1422_v29, 0  ;;  %v1717_v38 = vsel %vm1574_vm1, %v1423_v36, 0 }
 0x34f   : > { %v1209_v6 = vrot.slane %v1202_v0, %v4317_v7  ;;  %v1217_v8 = vrot.slane %v2996_v1, %v4317_v7  ;;  %v1225_v9 = vrot.slane %v1218_v2, %v4317_v7  ;;  %v1233_v10 = vrot.slane %v2997_v3, %v4317_v7  ;;  %3199 = vmatpush3.bf16.xpose.msra.mxu1 %v1579_v4 }
 0x350   : > { %3204 = vmatprep.subr.bf16.mxu1 %v3817_v5 }
 0x351   : > { %v1234_v12 = vcombine.low %v1209_v6, %v1217_v8  ;;  %v1250_v14 = vcombine.low %v1225_v9, %v1233_v10  ;;  %v1235_v26 = vcombine.high %v1209_v6, %v1217_v8  ;;  %v1251_v27 = vcombine.high %v1225_v9, %v1233_v10 }
 0x352   : > { %v1034_v8 = vsub.s32 2, %v4295_v42 }
 0x353   : > { %v1242_v17 = vrot.slane %v1234_v12, %v4320_v13  ;;  %v1258_v18 = vrot.slane %v1250_v14, %v4320_v13  ;;  %v1249_v31 = vrot.slane %v1235_v26, %v4320_v13  ;;  %v1265_v32 = vrot.slane %v1251_v27, %v4320_v13 }
 0x354   : > { %v1035_v9 = vrot.slane %v4299_v44, %v1034_v8 }
 0x355   : > { %v1266_v19 = vcombine.low %v1242_v17, %v1258_v18  ;;  %v1267_v28 = vcombine.high %v1242_v17, %v1258_v18  ;;  %v1268_v35 = vcombine.low %v1249_v31, %v1265_v32  ;;  %v1269_v39 = vcombine.high %v1249_v31, %v1265_v32 }
 0x356   : > { %v1119_v10 = vadd.f32 %v4314_v58, %v1035_v9 }
 0x357   : > { %v1270_v23 = vpack.c.bf16 %v1266_v19, %v1266_v19  ;;  %v1271_v30 = vpack.c.bf16 %v1267_v28, %v1267_v28  ;;  %v1272_v37 = vpack.c.bf16 %v1268_v35, %v1268_v35  ;;  %v1273_v40 = vpack.c.bf16 %v1269_v39, %v1269_v39 }
 0x359   : > { %3201 = vmatmul.mubr.msk.bf16.vlgmr.msra.gmra.mxu1 %vm1574_vm1, %v1270_v23 }
 0x35a   : > { %3205 = vmatpush3.bf16.xpose.msra.mxu1 %v1625_v24  ;;  %3206 = vmatprep.mubr.msk.bf16.mxu1 %vm3818_vm0, %v3817_v5 }
 0x35b   : > { %3210 = vmatprep.subr.bf16.mxu1 %v3817_v5 }
 0x361   : > { %3207 = vmatmul.mubr.msk.bf16.vlgmr.msra.gmra.mxu1 %vm1574_vm1, %v1271_v30 }
 0x362   : > { %3211 = vmatpush3.bf16.xpose.msra.mxu1 %v1671_v33  ;;  %3212 = vmatprep.mubr.msk.bf16.mxu1 %vm3818_vm0, %v3817_v5 }
 0x363   : > { %3216 = vmatprep.subr.bf16.mxu1 %v3817_v5 }
 0x369   : > { %3213 = vmatmul.mubr.msk.bf16.vlgmr.msra.gmra.mxu1 %vm1574_vm1, %v1272_v37 }
 0x36a   : > { %3217 = vmatpush3.bf16.xpose.msra.mxu1 %v1717_v38  ;;  %3218 = vmatprep.mubr.msk.bf16.mxu1 %vm3818_vm0, %v3817_v5 }
 0x36b   : > { %3222 = vmatprep.subr.bf16.mxu1 %v3817_v5 }
 0x371   : > { %3219 = vmatmul.mubr.msk.bf16.vlgmr.msra.gmra.mxu1 %vm1574_vm1, %v1273_v40 }
 0x372   : > { %3224 = vmatprep.mubr.msk.bf16.mxu1 %vm3818_vm0, %v3817_v5 }
 0x419   : > { %v1615_v41 = vpop.f32.mrf.mxu1 }
 0x41a   : > { %v1759_v45 = vmul.f32 0.17677669, %v1615_v41 }
 0x41b   : > { %v3202_v46 = vpop.f32.mrf.mxu1 }
 0x41c   : > { %v1764_v47 = vsel %vm1763_vm2, %v1759_v45, -inf }
 0x41d   : > { %1765 = vmax.xlane.f32.xlu1 %v1764_v47  ;;  %v1618_v49 = vpop.f32.mrf.mxu1 }
 0x41f   : > { %v3203_v50 = vpop.f32.mrf.mxu1 }
 0x421   : > { %v1661_v51 = vpop.f32.mrf.mxu1 }
 0x422   : > { %v1760_v52 = vmul.f32 0.17677669, %v1661_v51 }
 0x423   : > { %v3208_v53 = vpop.f32.mrf.mxu1 }
 0x424   : > { %v1767_v54 = vsel %vm1763_vm2, %v1760_v52, -inf }
 0x425   : > { %1768 = vmax.xlane.f32.xlu0 %v1767_v54  ;;  %v1664_v55 = vpop.f32.mrf.mxu1 }
 0x427   : > { %v3209_v56 = vpop.f32.mrf.mxu1 }
 0x429   : > { %v1707_v57 = vpop.f32.mrf.mxu1 }
 0x42a   : > { %v1761_v59 = vmul.f32 0.17677669, %v1707_v57 }
 0x42b   : > { %v3214_v60 = vpop.f32.mrf.mxu1 }
 0x42c   : > { %v1770_v61 = vsel %vm1763_vm2, %v1761_v59, -inf }
 0x42d   : > { %1771 = vmax.xlane.f32.xlu1 %v1770_v61  ;;  %v1710_v62 = vpop.f32.mrf.mxu1 }
 0x42f   : > { %v3215_v63 = vpop.f32.mrf.mxu1 }
 0x431   : > { %v1753_v0 = vpop.f32.mrf.mxu1 }
 0x432   : > { %v1762_v1 = vmul.f32 0.17677669, %v1753_v0 }
 0x433   : > { %v3220_v2 = vpop.f32.mrf.mxu1 }
 0x434   : > { %v1773_v3 = vsel %vm1763_vm2, %v1762_v1, -inf }
 0x435   : > { %1774 = vmax.xlane.f32.xlu1 %v1773_v3  ;;  %v1756_v4 = vpop.f32.mrf.mxu1 }
 0x437   : > { %v3221_v6 = vpop.f32.mrf.mxu1 }
 0x446   : > { %1425 = vrot.lane.b32.xlu1 %v1119_v10, %s3820_s8 }
 0x44a   : > { %1431 = vrot.lane.b32.xlu1 %v1119_v10, %s3819_s25 }
 0x4a6   : > { %v1766_v11 = vpop.xlane.xlu1 %1765 }
 0x4a7   : > { %v1776_v12 = vsub.f32 %v1759_v45, %v1766_v11 }
 0x4a9   : > { %v1780_v14 = vmul.f32 1.442695, %v1776_v12 }
 0x4ab   : > { %3482 = vpow2.f32 %v1780_v14 }
 0x4ae   : > { %v1769_v15 = vpop.xlane.xlu0 %1768 }
 0x4af   : > { %v1777_v16 = vsub.f32 %v1760_v52, %v1769_v15 }
 0x4b1   : > { %v1782_v17 = vmul.f32 1.442695, %v1777_v16 }
 0x4b3   : > { %3484 = vpow2.f32 %v1782_v17 }
 0x4b6   : > { %v1772_v20 = vpop.xlane.xlu1 %1771 }
 0x4b7   : > { %v1778_v21 = vsub.f32 %v1761_v59, %v1772_v20 }
 0x4b8   : > { %v4383_v18 = vpop.eup %3482 }
 0x4b9   : > { %v1788_v19 = vsel %vm1763_vm2, %v4383_v18, 0.0  ;;  %v1784_v23 = vmul.f32 1.442695, %v1778_v21 }
 0x4ba   : > { %1789 = vadd.xlane.f32.xlu0 %v1788_v19 }
 0x4bb   : > { %3486 = vpow2.f32 %v1784_v23 }
 0x4be   : > { %v1775_v22 = vpop.xlane.xlu1 %1774 }
 0x4bf   : > { %v1779_v24 = vsub.f32 %v1762_v1, %v1775_v22 }
 0x4c0   : > { %v4387_v44 = vpop.eup %3484 }
 0x4c1   : > { %v1791_v58 = vsel %vm1763_vm2, %v4387_v44, 0.0  ;;  %v1786_v25 = vmul.f32 1.442695, %v1779_v24 }
 0x4c2   : > { %1792 = vadd.xlane.f32.xlu1 %v1791_v58  ;;  %v1426_v30 = vpop.permute.xlu1 %1425 }
 0x4c3   : > { %3488 = vpow2.f32 %v1786_v25 }
 0x4c6   : > { %v1432_v31 = vpop.permute.xlu1 %1431 }
 0x4c7   : > { %v1450_v33 = vcombine.low %v1426_v30, %v1432_v31  ;;  %v1451_v34 = vcombine.high %v1426_v30, %v1432_v31 }
 0x4c8   : > { %v4392_v26 = vpop.eup %3486 }
 0x4c9   : > { %v1794_v27 = vsel %vm1763_vm2, %v4392_v26, 0.0  ;;  %v1458_v38 = vrot.slane %v1450_v33, %v4317_v7  ;;  %v1465_v39 = vrot.slane %v1451_v34, %v4317_v7 }
 0x4d0   : > { %1428 = vrot.lane.b32.xlu0 %v1119_v10, %s3821_s20  ;;  %v4396_v28 = vpop.eup %3488 }
 0x4d1   : > { %v1797_v29 = vsel %vm1763_vm2, %v4396_v28, 0.0 }
 0x4ef   : > { %1795 = vadd.xlane.f32.xlu0 %v1794_v27 }
 0x4f3   : > { %1798 = vadd.xlane.f32.xlu0 %v1797_v29 }
 0x543   : > { %v1790_v32 = vpop.xlane.xlu0 %1789 }
 0x544   : > { %3490 = vrcp.f32 %v1790_v32 }
 0x547   : > { %v1429_v35 = vpop.permute.xlu0 %1428 }
 0x548   : > { %v1434_v36 = vcombine.low %v1119_v10, %v1429_v35  ;;  %v1435_v37 = vcombine.high %v1119_v10, %v1429_v35 }
 0x54a   : > { %v1442_v40 = vrot.slane %v1434_v36, %v4317_v7  ;;  %v1449_v41 = vrot.slane %v1435_v37, %v4317_v7  ;;  %v3433_v37 = vld [vmem:[%s4167_s0 + $0x30] sm:$0xff]  }
 0x54b   : > { %v1793_v54 = vpop.xlane.xlu1 %1792 }
 0x54c   : > { %v1466_v45 = vcombine.low %v1442_v40, %v1458_v38  ;;  %v1467_v46 = vcombine.high %v1442_v40, %v1458_v38  ;;  %v1482_v47 = vcombine.low %v1449_v41, %v1465_v39  ;;  %v1483_v49 = vcombine.high %v1449_v41, %v1465_v39  ;;  %v3434_v38 = vld [vmem:[%s4167_s0 + $0x28] sm:$0xff]   ;;  %v3435_v39 = vld [vmem:[%s4167_s0 + $0x20] sm:$0xff]   ;;  %v3436_v40 = vld [vmem:[%s4167_s0 + $0x18] sm:$0xff]  }
 0x54d   : > { %3492 = vrcp.f32 %v1793_v54 }
 0x54e   : > { %v1474_v50 = vrot.slane %v1466_v45, %v4320_v13  ;;  %v1481_v51 = vrot.slane %v1467_v46, %v4320_v13  ;;  %v1490_v52 = vrot.slane %v1482_v47, %v4320_v13  ;;  %v1497_v53 = vrot.slane %v1483_v49, %v4320_v13 }
 0x550   : > { %v1502_v55 = vcombine.low %v1474_v50, %v1481_v51  ;;  %v3000_v56 = vcombine.high %v1474_v50, %v1481_v51  ;;  %v1518_v57 = vcombine.low %v1490_v52, %v1497_v53  ;;  %v3001_v59 = vcombine.high %v1490_v52, %v1497_v53 }
 0x551   : > { %v3491_v4 = vpop.eup %3490 }
 0x552   : > { %v1509_v60 = vrot.slane %v1502_v55, %v4317_v7  ;;  %v1517_v61 = vrot.slane %v3000_v56, %v4317_v7  ;;  %v1525_v62 = vrot.slane %v1518_v57, %v4317_v7  ;;  %v1533_v63 = vrot.slane %v3001_v59, %v4317_v7 }
 0x553   : > { %v1804_v12 = vmul.f32 %v3491_v4, %v4383_v18 }
 0x554   : > { %v1534_v0 = vcombine.low %v1509_v60, %v1517_v61  ;;  %v1550_v1 = vcombine.low %v1525_v62, %v1533_v63  ;;  %v1535_v9 = vcombine.high %v1509_v60, %v1517_v61  ;;  %v1551_v10 = vcombine.high %v1525_v62, %v1533_v63 }
 0x555   : > { %v1808_v58 = vpack.c.bf16 %v1804_v12, %v1804_v12 }
 0x556   : > { %v1542_v2 = vrot.slane %v1534_v0, %v4320_v13  ;;  %v1558_v3 = vrot.slane %v1550_v1, %v4320_v13  ;;  %v1549_v16 = vrot.slane %v1535_v9, %v4320_v13  ;;  %v1565_v17 = vrot.slane %v1551_v10, %v4320_v13 }
 0x558   : > { %v1566_v6 = vcombine.low %v1542_v2, %v1558_v3  ;;  %v1567_v8 = vcombine.high %v1542_v2, %v1558_v3  ;;  %v1568_v21 = vcombine.low %v1549_v16, %v1565_v17  ;;  %v1569_v29 = vcombine.high %v1549_v16, %v1565_v17 }
 0x55a   : > { %v1570_v11 = vpack.c.bf16 %v1566_v6, %v1566_v6  ;;  %v1571_v15 = vpack.c.bf16 %v1567_v8, %v1567_v8  ;;  %v3493_v19 = vpop.eup %3492  ;;  %v1572_v22 = vpack.c.bf16 %v1568_v21, %v1568_v21  ;;  %v1573_v31 = vpack.c.bf16 %v1569_v29, %v1569_v29 }
 0x55b   : > { %v1805_v18 = vmul.f32 %v3493_v19, %v4387_v44 }
 0x55c   : > { %v1817_v14 = vsel %vm1815_vm3, %v1570_v11, 0  ;;  %v1863_v20 = vsel %vm1815_vm3, %v1571_v15, 0  ;;  %v1909_v24 = vsel %vm1815_vm3, %v1572_v22, 0  ;;  %v1955_v34 = vsel %vm1815_vm3, %v1573_v31, 0  ;;  %v3438_v11 = vld [vmem:[%s4167_s0 + $0x8] sm:$0xff]  }
 0x55d   : > { %3223 = vmatpush3.bf16.msra.mxu1 %v1817_v14  ;;  %v1809_v23 = vpack.c.bf16 %v1805_v18, %v1805_v18  ;;  %v3439_v18 = vld [vmem:[%s4167_s0] sm:$0xff]  }
 0x55e   : > { %3228 = vmatprep.subr.bf16.mxu1 %v3817_v5 }
 0x560   : > { %3225 = vmatmul.mubr.msk.bf16.vlgmr.msra.gmra.mxu1 %vm1763_vm2, %v1808_v58 }
 0x561   : > { %3229 = vmatpush3.bf16.msra.mxu1 %v1863_v20  ;;  %3230 = vmatprep.mubr.msk.bf16.mxu1 %vm3818_vm0, %v3817_v5 }
 0x562   : > { %3234 = vmatprep.subr.bf16.mxu1 %v3817_v5 }
 0x568   : > { %3231 = vmatmul.mubr.msk.bf16.vlgmr.msra.gmra.mxu1 %vm1763_vm2, %v1809_v23 }
 0x569   : > { %3235 = vmatpush3.bf16.msra.mxu1 %v1909_v24  ;;  %3236 = vmatprep.mubr.msk.bf16.mxu1 %vm3818_vm0, %v3817_v5 }
 0x56a   : > { %3240 = vmatprep.subr.bf16.mxu1 %v3817_v5 }
 0x578   : > { %v1796_v25 = vpop.xlane.xlu0 %1795 }
 0x579   : > { %3494 = vrcp.f32 %v1796_v25 }
 0x57c   : > { %v1799_v27 = vpop.xlane.xlu0 %1798 }
 0x57d   : > { %3496 = vrcp.f32 %v1799_v27 }
 0x586   : > { %v3495_v44 = vpop.eup %3494 }
 0x587   : > { %v1806_v30 = vmul.f32 %v3495_v44, %v4392_v26  ;;  %v3432_v26 = vld [vmem:[%s4167_s0 + $0x38] sm:$0xff]  }
 0x588   : > { %3247 = vmatpush3.bf16.msra.mxu0 %v3432_v26 }
 0x589   : > { %v1810_v32 = vpack.c.bf16 %v1806_v30, %v1806_v30  ;;  %3248 = vmatprep.subr.bf16.mxu0 %v3817_v5 }
 0x58a   : > { %v3497_v33 = vpop.eup %3496 }
 0x58b   : > { %3237 = vmatmul.mubr.msk.bf16.vlgmr.msra.gmra.mxu1 %vm1763_vm2, %v1810_v32  ;;  %v1807_v35 = vmul.f32 %v3497_v33, %v4396_v28  ;;  %v3437_v28 = vld [vmem:[%s4167_s0 + $0x10] sm:$0xff]  }
 0x58c   : > { %3241 = vmatpush3.bf16.msra.mxu1 %v1955_v34  ;;  %3242 = vmatprep.mubr.msk.bf16.mxu1 %vm3818_vm0, %v3817_v5 }
 0x58d   : > { %v1811_v36 = vpack.c.bf16 %v1807_v35, %v1807_v35  ;;  %3249 = vmatpush3.bf16.msra.mxu0 %v3433_v37 }
 0x58e   : > { %3250 = vmatprep.subr.bf16.mxu0 %v3817_v5 }
 0x591   : > { %3251 = vmatpush3.bf16.msra.mxu0 %v3434_v38 }
 0x592   : > { %3252 = vmatprep.subr.bf16.mxu0 %v3817_v5 }
 0x593   : > { %3243 = vmatmul.mubr.msk.bf16.vlgmr.msra.gmra.mxu1 %vm1763_vm2, %v1811_v36 }
 0x595   : > { %3253 = vmatpush3.bf16.msra.mxu0 %v3435_v39 }
 0x596   : > { %3254 = vmatprep.subr.bf16.mxu0 %v3817_v5 }
 0x599   : > { %3255 = vmatpush3.bf16.msra.mxu0 %v3436_v40 }
 0x59a   : > { %3256 = vmatprep.subr.bf16.mxu0 %v3817_v5 }
 0x59d   : > { %3257 = vmatpush3.bf16.msra.mxu0 %v3437_v28 }
 0x59e   : > { %3258 = vmatprep.subr.bf16.mxu0 %v3817_v5 }
 0x5a1   : > { %3259 = vmatpush3.bf16.msra.mxu0 %v3438_v11  ;;  %v3463_v11 = vld [vmem:[%s4169_s7 + $0x4] ss:$8 sps:$4 sm:$0xff]  }
 0x5a2   : > { %3260 = vmatprep.subr.bf16.mxu0 %v3817_v5 }
 0x5a5   : > { %3261 = vmatpush3.bf16.msra.mxu0 %v3439_v18 }
 0x620   : > { %v1853_v41 = vpop.f32.mrf.mxu1 }
 0x622   : > { %v3226_v45 = vpop.f32.mrf.mxu1 }
 0x624   : > { %v1856_v46 = vpop.f32.mrf.mxu1 }
 0x626   : > { %v3227_v47 = vpop.f32.mrf.mxu1 }
 0x628   : > { %v1899_v49 = vpop.f32.mrf.mxu1 }
 0x62a   : > { %v3232_v50 = vpop.f32.mrf.mxu1 }
 0x62c   : > { %v1902_v51 = vpop.f32.mrf.mxu1 }
 0x62e   : > { %v3233_v52 = vpop.f32.mrf.mxu1 }
 0x64b   : > { %v1945_v53 = vpop.f32.mrf.mxu1 }
 0x64c   : > { %v1997_v57 = vcombine.low %v1853_v41, %v1945_v53  ;;  %v1998_v59 = vcombine.high %v1853_v41, %v1945_v53  ;;  %v3012_v41 = vld [vmem:[%s749_s6] ss:$0 sm:$0xff]  ;;  %v3440_v53 = vld [vmem:[%s4169_s7 + $0x70] ss:$8 sps:$4 sm:$0xff]  }
 0x64d   : > { %v3238_v54 = vpop.f32.mrf.mxu1 }
 0x64e   : > { %v2005_v0 = vrot.slane %v1997_v57, %v4317_v7  ;;  %v2012_v1 = vrot.slane %v1998_v59, %v4317_v7  ;;  %v3442_v54 = vld [vmem:[%s4169_s7 + $0x74] ss:$8 sps:$4 sm:$0xff]  }
 0x64f   : > { %v1948_v55 = vpop.f32.mrf.mxu1  ;;  %2399 = vmatprep.subr.bf16.mxu1 %v3442_v54 }
 0x650   : > { %v3445_v55 = vld [vmem:[%s4169_s7 + $0x64] ss:$8 sps:$4 sm:$0xff]   ;;  %2400 = vmatpush1.bf16.msra.mxu1 %v3440_v53 }
 0x651   : > { %v3239_v56 = vpop.f32.mrf.mxu1  ;;  %2401 = vmatprep.subr.bf16.mxu1 %v3445_v55 }
 0x652   : > { %v3443_v56 = vld [vmem:[%s4169_s7 + $0x60] ss:$8 sps:$4 sm:$0xff]  }
 0x653   : > { %v1991_v60 = vpop.f32.mrf.mxu1 }
 0x654   : > { %v2013_v61 = vcombine.low %v1899_v49, %v1991_v60  ;;  %v2014_v62 = vcombine.high %v1899_v49, %v1991_v60  ;;  %v3504_v49 = vld [vmem:[#allocation2] sm:$0xff]  ;;  %2402 = vmatpush1.bf16.msra.mxu1 %v3443_v56 }
 0x655   : > { %v3244_v63 = vpop.f32.mrf.mxu1 }
 0x656   : > { %v2021_v2 = vrot.slane %v2013_v61, %v4317_v7  ;;  %v2028_v3 = vrot.slane %v2014_v62, %v4317_v7  ;;  %v3448_v62 = vld [vmem:[%s4169_s7 + $0x54] ss:$8 sps:$4 sm:$0xff]   ;;  %v3446_v63 = vld [vmem:[%s4169_s7 + $0x50] ss:$8 sps:$4 sm:$0xff]  }
 0x657   : > { %v1994_v4 = vpop.f32.mrf.mxu1  ;;  %2403 = vmatprep.subr.bf16.mxu1 %v3448_v62 }
 0x658   : > { %v2029_v6 = vcombine.low %v2005_v0, %v2021_v2  ;;  %v2030_v8 = vcombine.high %v2005_v0, %v2021_v2  ;;  %v2045_v9 = vcombine.low %v2012_v1, %v2028_v3  ;;  %v2046_v10 = vcombine.high %v2012_v1, %v2028_v3  ;;  %2404 = vmatpush1.bf16.msra.mxu1 %v3446_v63  ;;  %v3449_v0 = vld [vmem:[%s4169_s7 + $0x40] ss:$8 sps:$4 sm:$0xff]   ;;  %v3451_v1 = vld [vmem:[%s4169_s7 + $0x44] ss:$8 sps:$4 sm:$0xff]   ;;  %v3454_v2 = vld [vmem:[%s4169_s7 + $0x34] ss:$8 sps:$4 sm:$0xff]  }
 0x659   : > { %v3245_v12 = vpop.f32.mrf.mxu1  ;;  %2405 = vmatprep.subr.bf16.mxu1 %v3451_v1  ;;  %v3452_v3 = vld [vmem:[%s4169_s7 + $0x30] ss:$8 sps:$4 sm:$0xff]   ;;  %v3824_v4 = vmov 0  }
 0x65a   : > { %v2037_v14 = vrot.slane %v2029_v6, %v4320_v13  ;;  %v2044_v15 = vrot.slane %v2030_v8, %v4320_v13  ;;  %v2053_v16 = vrot.slane %v2045_v9, %v4320_v13  ;;  %v2060_v17 = vrot.slane %v2046_v10, %v4320_v13  ;;  %2431 = vmatprep.mubr.bf16.mxu1 %v3824_v4  ;;  %v3457_v6 = vld [vmem:[%s4169_s7 + $0x24] ss:$8 sps:$4 sm:$0xff]   ;;  %v3455_v8 = vld [vmem:[%s4169_s7 + $0x20] ss:$8 sps:$4 sm:$0xff]   ;;  %v3460_v9 = vld [vmem:[%s4169_s7 + $0x14] ss:$8 sps:$4 sm:$0xff]  }
 0x65b   : > { %v3458_v10 = vld [vmem:[%s4169_s7 + $0x10] ss:$8 sps:$4 sm:$0xff]   ;;  %v3461_v12 = vld [vmem:[%s4169_s7] ss:$8 sps:$4 sm:$0xff]  }
 0x65c   : > { %v2065_v19 = vcombine.low %v2037_v14, %v2044_v15  ;;  %v3010_v58 = vcombine.high %v2037_v14, %v2044_v15  ;;  %v2081_v20 = vcombine.low %v2053_v16, %v2060_v17  ;;  %v3011_v21 = vcombine.high %v2053_v16, %v2060_v17  ;;  %2406 = vmatpush1.bf16.msra.mxu1 %v3449_v0 }
 0x65d   : > { %2407 = vmatprep.subr.bf16.mxu1 %v3454_v2 }
 0x65e   : > { %v2072_v22 = vrot.slane %v2065_v19, %v4317_v7  ;;  %v2080_v23 = vrot.slane %v3010_v58, %v4317_v7  ;;  %v2088_v24 = vrot.slane %v2081_v20, %v4317_v7  ;;  %v2096_v25 = vrot.slane %v3011_v21, %v4317_v7  ;;  %v3021_v19 = vld [vmem:[%s752_s29] ss:$0 sm:$0xff]  ;;  %s4701_s29 = sld [smem:[#allocation25_spill]] }
 0x65f   : > { %v3022_v20 = vld [vmem:[%s755_s18] ss:$0 sm:$0xff] }
 0x660   : > { %v2098_v27 = vcombine.high %v2072_v22, %v2080_v23  ;;  %v2114_v29 = vcombine.high %v2088_v24, %v2096_v25  ;;  %v2097_v44 = vcombine.low %v2072_v22, %v2080_v23  ;;  %v2113_v30 = vcombine.low %v2088_v24, %v2096_v25  ;;  %2408 = vmatpush1.bf16.msra.mxu1 %v3452_v3  ;;  %v3464_v23 = vld [vmem:[%s4175_s9 + $0x78] sm:$0xff]   ;;  %v3466_v25 = vld [vmem:[%s4175_s9 + $0x70] sm:$0xff]  }
 0x661   : > { %2409 = vmatprep.subr.bf16.mxu1 %v3457_v6  ;;  %v3465_v24 = vld [vmem:[%s4175_s9 + $0x38] sm:$0xff]   ;;  %3116 = vmatprep.subr.bf16.mxu0 %v3464_v23 }
 0x662   : > { %v2112_v5 = vrot.slane %v2098_v27, %v4320_v13  ;;  %v2128_v31 = vrot.slane %v2114_v29, %v4320_v13  ;;  %v2105_v32 = vrot.slane %v2097_v44, %v4320_v13  ;;  %v2121_v33 = vrot.slane %v2113_v30, %v4320_v13  ;;  %v3467_v27 = vld [vmem:[%s4175_s9 + $0x30] sm:$0xff]   ;;  %v3468_v29 = vld [vmem:[%s4175_s9 + $0x68] sm:$0xff]   ;;  %v3470_v30 = vld [vmem:[%s4175_s9 + $0x60] sm:$0xff]  }
 0x663   : > { %v3469_v44 = vld [vmem:[%s4175_s9 + $0x28] sm:$0xff]  }
 0x664   : > { %v2131_v34 = vcombine.low %v2112_v5, %v2128_v31  ;;  %v2130_v35 = vcombine.high %v2105_v32, %v2121_v33  ;;  %v2129_v36 = vcombine.low %v2105_v32, %v2121_v33  ;;  %v2132_v7 = vcombine.high %v2112_v5, %v2128_v31  ;;  %2410 = vmatpush1.bf16.msra.mxu1 %v3455_v8  ;;  %v3471_v5 = vld [vmem:[%s4175_s9 + $0x20] sm:$0xff]   ;;  %v3472_v31 = vld [vmem:[%s4175_s9 + $0x58] sm:$0xff]   ;;  %v3474_v33 = vld [vmem:[%s4175_s9 + $0x50] sm:$0xff]   ;;  %p3056_p12 = scmp.ne.s32.totalorder %s4701_s29, 1 }
 0x665   : > { %2411 = vmatprep.subr.bf16.mxu1 %v3460_v9  ;;  %v3473_v32 = vld [vmem:[%s4175_s9 + $0x18] sm:$0xff]  }
 0x666   : > { %2138 = vrot.lane.b32.xlu0 %v2131_v34, %s3821_s20  ;;  %2134 = vrot.lane.b32.xlu1 %v2130_v35, %s3819_s25  ;;  %v3475_v34 = vld [vmem:[%s4175_s9 + $0x10] sm:$0xff]   ;;  %v3476_v35 = vld [vmem:[%s4175_s9 + $0x48] sm:$0xff]  }
 0x668   : > { %2412 = vmatpush1.bf16.msra.mxu1 %v3458_v10 }
 0x669   : > { %2413 = vmatprep.subr.bf16.mxu1 %v3463_v11 }
 0x66a   : > { %2142 = vrot.lane.b32.xlu1 %v2132_v7, %s3820_s8  ;;  %v3478_v7 = vld [vmem:[%s4175_s9 + $0x40] sm:$0xff]  }
 0x66c   : > { %2414 = vmatpush1.bf16.msra.mxu1 %v3461_v12 }
 0x6d8   : > { %v2135_v26 = vpop.permute.xlu1 %2134  ;;  %v2139_v37 = vpop.permute.xlu0 %2138 }
 0x6d9   : > { %v2145_v38 = vsel %vm1574_vm1, %v2129_v36, %v2135_v26  ;;  %v3477_v36 = vld [vmem:[%s4175_s9 + $0x8] sm:$0xff]   ;;  %v3479_v26 = vld [vmem:[%s4175_s9] sm:$0xff]  }
 0x6da   : > { %v2147_v39 = vsel %vm2146_vm4, %v2145_v38, %v2139_v37  ;;  %v2307_v37 = vld [vmem:[%s4217_s11] sm:$0x3]  ;;  %s4700_s11 = scalar_lea.vmem [#allocation12], %s4156_s30 }
 0x6db   : > { %v2312_v38 = vrot.slane %v2307_v37, %v816_v48  ;;  %v3039_v4 = vld [vmem:[%s4700_s11] ss:$0 sm:$0xff] }
 0x6dc   : > { %v2143_v13 = vpop.permute.xlu1 %2142 }
 0x6dd   : > { %v2149_v40 = vsel %vm2148_vm5, %v2147_v39, %v2143_v13  ;;  %v2316_v13 = vrot.slane %v2307_v37, %v925_v43 }
 0x6de   : > { %v2150_v28 = vpack.c.bf16 %v2149_v40, %v2149_v40 }
 0x6e0   : > { %3263 = vmatmul.mubr.bf16.vlgmr.msra.gmra.mxu0 %v2150_v28 }
 0x6e1   : > { %3117 = vmatpush3.bf16.msra.mxu0 %v3465_v24 }
 0x6e2   : > { %3118 = vmatprep.subr.bf16.mxu0 %v3466_v25 }
 0x6e5   : > { %3119 = vmatpush3.bf16.msra.mxu0 %v3467_v27 }
 0x6e6   : > { %3120 = vmatprep.subr.bf16.mxu0 %v3468_v29 }
 0x6e9   : > { %3121 = vmatpush3.bf16.msra.mxu0 %v3469_v44 }
 0x6ea   : > { %3122 = vmatprep.subr.bf16.mxu0 %v3470_v30 }
 0x6ed   : > { %3123 = vmatpush3.bf16.msra.mxu0 %v3471_v5 }
 0x6ee   : > { %3124 = vmatprep.subr.bf16.mxu0 %v3472_v31 }
 0x6f1   : > { %3125 = vmatpush3.bf16.msra.mxu0 %v3473_v32 }
 0x6f2   : > { %3126 = vmatprep.subr.bf16.mxu0 %v3474_v33 }
 0x6f5   : > { %3127 = vmatpush3.bf16.msra.mxu0 %v3475_v34 }
 0x6f6   : > { %3128 = vmatprep.subr.bf16.mxu0 %v3476_v35 }
 0x6f9   : > { %3129 = vmatpush3.bf16.msra.mxu0 %v3477_v36 }
 0x6fa   : > { %3130 = vmatprep.subr.bf16.mxu0 %v3478_v7 }
 0x6fd   : > { %3131 = vmatpush3.bf16.msra.mxu0 %v3479_v26 }
 0x7a0   : > { %v2256_v45 = vpop.f32.mrf.mxu0 }
 0x7a1   : > { %v2257_v46 = vadd.f32 %v3012_v41, %v2256_v45 }
 0x7a2   : > { %v3264_v47 = vpop.f32.mrf.mxu0 }
 0x7a3   : > { %v4477_v50 = vadd.f32 %v3504_v49, %v2257_v46 }
 0x7a4   : > { %v2259_v51 = vpop.f32.mrf.mxu0 }
 0x7a5   : > { %2265 = vadd.xlane.f32.xlu1 %v4477_v50 }
 0x7a6   : > { %v3265_v52 = vpop.f32.mrf.mxu0 }
 0x82e   : > { %v2266_v57 = vpop.xlane.xlu1 %2265 }
 0x82f   : > { %v2267_v59 = vmul.f32 0.0078125, %v2266_v57 }
 0x831   : > { %v2268_v60 = vsub.f32 %v4477_v50, %v2267_v59 }
 0x833   : > { %v2269_v61 = vmul.f32 %v2268_v60, %v2268_v60 }
 0x835   : > { %2270 = vadd.xlane.f32.xlu0 %v2269_v61 }
 0x8be   : > { %v2271_v14 = vpop.xlane.xlu0 %2270 }
 0x8bf   : > { %v2272_v15 = vmul.f32 0.0078125, %v2271_v14 }
 0x8c1   : > { %v2273_v16 = vadd.f32 1e-05, %v2272_v15 }
 0x8c3   : > { %3498 = vrsqrt.f32 %v2273_v16 }
 0x8d0   : > { %v3499_v17 = vpop.eup %3498 }
 0x8d1   : > { %v2275_v58 = vmul.f32 %v3499_v17, %v2268_v60 }
 0x8d3   : > { %v2282_v21 = vmul.f32 %v3021_v19, %v2275_v58 }
 0x8d5   : > { %v2289_v18 = vadd.f32 %v3022_v20, %v2282_v21 }
 0x8d7   : > { %v2290_v22 = vpack.c.bf16 %v2289_v18, %v2289_v18 }
 0x8d9   : > { %2432 = vmatmul.mubr.bf16.vlgmr.msra.gmra.mxu1 %v2290_v22 }
 0x999   : > { %v2433_v39 = vpop.f32.mrf.mxu1 }
 0x99a   : > { %v2434_v40 = vadd.f32 %v2433_v39, %v2312_v38 }
 0x99b   : > { %v2435_v28 = vpop.f32.mrf.mxu1 }
 0x99c   : > { %v2442_v41 = vmul.f32 0.044715, %v2434_v40  ;;  %v2436_v45 = vadd.f32 %v2435_v28, %v2316_v13  ;;  %v2440_v60 = vmul.f32 0.5, %v2434_v40 }
 0x99d   : > { %v2437_v46 = vpop.f32.mrf.mxu1 }
 0x99e   : > { %v2444_v47 = vmul.f32 %v2442_v41, %v2434_v40  ;;  %v2443_v49 = vmul.f32 0.044715, %v2436_v45  ;;  %v2441_v61 = vmul.f32 0.5, %v2436_v45 }
 0x99f   : > { %v2438_v51 = vpop.f32.mrf.mxu1 }
 0x9a0   : > { %v2446_v52 = vmul.f32 %v2444_v47, %v2434_v40  ;;  %v2445_v53 = vmul.f32 %v2443_v49, %v2436_v45 }
 0x9a2   : > { %v2448_v54 = vadd.f32 %v2446_v52, %v2434_v40  ;;  %v2447_v55 = vmul.f32 %v2445_v53, %v2436_v45 }
 0x9a4   : > { %v2450_v56 = vmul.f32 0.7978846, %v2448_v54  ;;  %v2449_v57 = vadd.f32 %v2447_v55, %v2436_v45 }
 0x9a6   : > { %v2451_v59 = vmul.f32 0.7978846, %v2449_v57  ;;  %3500 = vtanh.f32 %v2450_v56 }
 0x9a8   : > { %3502 = vtanh.f32 %v2451_v59 }
 0x9b3   : > { %v3501_v42 = vpop.eup %3500 }
 0x9b4   : > { %v2454_v43 = vadd.f32 1.0, %v3501_v42 }
 0x9b5   : > { %v3503_v48 = vpop.eup %3502 }
 0x9b6   : > { %v2455_v62 = vadd.f32 1.0, %v3503_v48  ;;  %v2456_v63 = vmul.f32 %v2454_v43, %v2440_v60 }
 0x9b8   : > { %v2457_v0 = vmul.f32 %v2455_v62, %v2441_v61  ;;  %v2458_v2 = vpack.c.bf16 %v2456_v63, %v2456_v63 }
 0x9ba   : > { %v2459_v1 = vpack.c.bf16 %v2457_v0, %v2457_v0 }
 0x9bc   : > { %2627 = vmatprep.mubr.bf16.mxu0 %v2459_v1 }
 0x9bd   : > { %2628 = vmatmul.mubr.bf16.vlgmr.msra.gmra.mxu0 %v2458_v2 }
 0xa7d   : > { %v3132_v3 = vpop.f32.mrf.mxu0 }
 0xa7f   : > { %v3133_v6 = vpop.f32.mrf.mxu0 }
 0xa80   : > { %v3134_v8 = vadd.f32 %v3133_v6, %v3132_v3 }
 0xa81   : > { %v3135_v9 = vpop.f32.mrf.mxu0 }
 0xa82   : > { %v2630_v10 = vadd.f32 %v3134_v8, %v3039_v4  ;;  %2640 = sbr.rel (%p3056_p12) target bundleno = 2696 (0xa88), region = 104 }
 0xa83   : > { %v3136_v11 = vpop.f32.mrf.mxu0 }
 0xa84   : > { %v2635_v12 = vadd.f32 %v2630_v10, %v4477_v50 }
 0xa86   : > { %2636 = vst [vmem:[#allocation2] sm:$0xff] %v2635_v12 }
 0xa87   : > { %2641 = vst [vmem:[%s4221_s10] sm:$0xff] %v2635_v12 }
 0xa88 PF: > { %s4702_s18 = sld [smem:[#allocation26_spill]]  ;;  %s2656_s28 = sshll.u32 %s4221_s10, 4  ;;  %s2657_s28 = int_to_ptr.vmem [resolvable:$true] %s2656_s28 }
 0xa89   : > { %s4704_s24 = sld [smem:[#allocation50_spill]]  ;;  %s2643_s16 = scalar_lea.sflag [#allocation5], %s4142_s4 }
 0xa8a   : > { %s3673_s12 = scalar_lea.vmem %s2657_s28, 128  ;;  %s3825_s22 = smov [#allocation14]  }
 0xa8b   : > { %p3674_p5 = scmp.ne.s32.totalorder %s2657_s28, %s3673_s12  ;;  %s3677_s13 = sshll.u32 %s3825_s22, 4  ;;  %s3678_s13 = int_to_ptr.vmem [resolvable:$false] %s3677_s13 }
 0xa8c   : > { %s3679_s2 = scalar_lea.vmem %s3678_s13, 256  ;;  %p3680_p7 = scmp.lt.s32.totalorder %s2657_s28, %s3678_s13 }
 0xa8d   : > { %p3675_p11 = pnand %p3674_p5, %p4075_p9  ;;  %p3681_p13 = scmp.lt.s32.totalorder %s3679_s2, %s3673_s12 }
 0xa8e   : > { %s3058_s30 = sshll.u32 %s4702_s18, 7 }
 0xa8f   : > { %s2654_s17 = scalar_lea.hbm %s4704_s24, %s3058_s30  ;;  %p3676_p0 = pneg %p3675_p11 }
 0xa90   : > { %p3682_p10 = por %p3681_p13, %p3680_p7 }
 0xa92   : > { %p3683_p2 = pnand %p3682_p10, %p3676_p0 }
 0xa94   : > { %3686 = shalt.err (!%p3683_p2)
}
 0xa95   : > { %s3687_s3 = scalar_lea.hbm %s2654_s17, 128  ;;  %s3691_s15 = scalar_lea.hbm %s4704_s24, 256 }
 0xa96   : > { %p3688_p1 = scmp.ne.s32.totalorder %s2654_s17, %s3687_s3  ;;  %p3692_p4 = scmp.lt.s32.totalorder %s2654_s17, %s4704_s24 }
 0xa97   : > { %p3693_p3 = scmp.lt.s32.totalorder %s3691_s15, %s3687_s3 }
 0xa98   : > { %p3689_p8 = pnand %p3688_p1, %p4075_p9 }
 0xa99   : > { %p3694_p12 = por %p3693_p3, %p3692_p4 }
 0xa9a   : > { %p3690_p6 = pneg %p3689_p8 }
 0xa9c   : > { %p3695_p5 = pnand %p3694_p12, %p3690_p6 }
 0xa9e   : > { %3698 = shalt.err (!%p3695_p5)
}
 0xa9f   : > { %3281 = dma.vmem_to_hbm [thread:$0]  (%p4075_p9), %s2657_s28, 128, %s2654_s17, %s2643_s16  }
 0xaa0 PF: > { %s4705_s20 = sld [smem:[#allocation29_spill]] }
 0xaa1   : > { %s4706_s0 = sld [smem:[#allocation22_spill]] }
 0xaa2   : > { %s4707_s19 = sld [smem:[#allocation36_spill]] }
 0xaa6   : > { %p3307_p11 = scmp.ge.s32.totalorder %s4705_s20, 2 }
 0xaa7   : > { %s2668_s5 = sand.u32 1, %s4706_s0  }
 0xaa8   : > { %p4708_p0 = scmp.ne.s32.totalorder %s4707_s19, 0  ;;  %s2669_s6 = scalar_lea.sflag [#allocation5], %s2668_s5 }
 0xaaa   : > { %p3303_p7 = pnand %p3307_p11, %p4708_p0 }
 0xaac   : > { %p3304_p13 = pneg %p3303_p7 }
 0xaae   : > { %3760 = dma.done.wait (%p3304_p13), %s2669_s6, 128  }
 0xaaf   : > { %3762 = vsyncadd (%p3304_p13), %s2669_s6, 4294967168  ;;  %s38_s18 = sadd.s32 1, %s4705_s20   ;;  %s4709_s25 = sld [smem:[#allocation20_spill]] }
 0xab0   : > { %p35_p10 = scmp.ge.s32.totalorder %s38_s18, 6   ;;  %s4710_s26 = sld [smem:[#allocation21_spill]] }
 0xab1   : > { %s4711_s27 = sld [smem:[#allocation33_spill]] }
 0xab2   : > { %s4712_s28 = sld [smem:[#allocation23_spill]] }
 0xab3   : > { %s4713_s29 = sld [smem:[#allocation24_spill]] }
 0xab4   : > { %s4714_s30 = sld [smem:[#allocation34_spill]]  ;;  %37 = sbr.rel (!%p35_p10) target bundleno = 30 (0x1e), region = 209 }
 0xab5   : > { %s4715_s14 = sld [smem:[#allocation27_spill]] }
 0xab6   : > { %s4716_s15 = sld [smem:[#allocation28_spill]] }
 0xab7   : > { %s4717_s16 = sld [smem:[#allocation30_spill]] }
 0xab8   : > { %s4718_s17 = sld [smem:[#allocation31_spill]] }
 0xab9   :  { %2674 = vsyncpa [#allocation4], 1 }
 0xaba   :  { %2676 = vsyncpa [#allocation4 + $0x1], 1 }
 0xabb   :  { %2677 = vsyncpa [#allocation7], 1 }
 0xabc   :  { %2679 = vsyncpa [#allocation7 + $0x1], 1 }
 0xabd   :  { %2680 = vsyncpa [#allocation10], 1 }
 0xabe   :  { %2682 = vsyncpa [#allocation10 + $0x1], 1 }
 0xabf   :  { %2683 = vsyncpa [#allocation13], 1 }
 0xac0   :  { %2685 = vsyncpa [#allocation13 + $0x1], 1 }
 0xac1   :  { %2686 = vsyncpa [#allocation5], 1 }
 0xac2   :  { %2688 = vsyncpa [#allocation5 + $0x1], 1 }

</bundles_post_ra>
